<compile_context>
chip_gen: v6e
topology: v6e:2x2x1
jax: 0.10.0
libtpu: 0.0.40
codegen_flags: <defaults>
</compile_context>

<pallas_src>
import math
from functools import partial

import jax
import jax.numpy as jnp
from jax import lax
from jax.experimental import pallas as pl
from jax.experimental.pallas import tpu as pltpu

_LN_EPS = 1e-5


# ---------------------------------------------------------------------------
# Fused decoder kernel (whole stack, one batch element per grid step)
# ---------------------------------------------------------------------------
def _make_decoder_kernel(*, heads, head_dim, embed_size, num_layers,
                         use_bf16=False):
    inv_scale = 1.0 / math.sqrt(float(embed_size))
    mxu_dtype = jnp.bfloat16 if use_bf16 else jnp.float32

    def mm(a, b):
        return jnp.dot(a.astype(mxu_dtype), b.astype(mxu_dtype),
                       preferred_element_type=jnp.float32)

    def layer_norm(z, gamma, beta):
        mu = jnp.mean(z, axis=-1, keepdims=True)
        zc = z - mu
        var = jnp.mean(zc * zc, axis=-1, keepdims=True)
        return (zc * lax.rsqrt(var + jnp.float32(_LN_EPS))) * gamma + beta

    def attention(q_in, kv_in, bias, wq, wk, wv, wfc, bfc, gamma, beta):
        # Per-head q/k/v projections batched into single lane-dense matmuls
        # via block-diagonal, pre-transposed weights; 1/sqrt(E) folded into q.
        # TODO(synk): at real embed sizes the block-diagonal (E,E) weight
        # wastes (heads-1)/heads of the MXU FLOPs and heads x VMEM; switch to
        # the true shared (hd,hd) weight on a (S*heads, hd) layout then.
        q_p = mm(q_in, wq) * jnp.float32(inv_scale)
        k_p = mm(kv_in, wk)
        v_p = mm(kv_in, wv)

        # Per-head attention with fc_out accumulated per head: no concat /
        # cross-lane shuffle of head outputs.
        y = None
        for h in range(heads):                    # static unrolled head loop
            lo, hi = h * head_dim, (h + 1) * head_dim
            qh, kh, vh = q_p[:, lo:hi], k_p[:, lo:hi], v_p[:, lo:hi]
            # q @ k^T without materializing a transpose.
            energy = lax.dot_general(
                qh.astype(mxu_dtype), kh.astype(mxu_dtype),
                (((1,), (1,)), ((), ())),
                preferred_element_type=jnp.float32)
            energy = energy + bias                # additive mask (pre-scaled)
            m = jnp.max(energy, axis=-1, keepdims=True)
            p = jnp.exp(energy - m)
            s = jnp.sum(p, axis=-1, keepdims=True)
            attn = p / s                          # exact softmax normalization
            ho = mm(attn, vh)                     # (q_len, head_dim)
            contrib = mm(ho, wfc[lo:hi, :])       # fold fc_out per head
            y = contrib if y is None else y + contrib

        z = y + bfc + q_in                        # fc_out bias + residual
        return layer_norm(z, gamma, beta)

    def kernel(x_ref, enc_ref, trg_bias_ref, src_bias_ref,
               wq_sa_ref, wk_sa_ref, wv_sa_ref, wfc_sa_ref, bfc_sa_ref,
               g_sa_ref, bt_sa_ref,
               wq_ca_ref, wk_ca_ref, wv_ca_ref, wfc_ca_ref, bfc_ca_ref,
               g_ca_ref, bt_ca_ref,
               w1_ref, b1_ref, w2_ref, b2_ref, g_ff_ref, bt_ff_ref,
               wout_ref, bout_ref, out_ref):
        h = x_ref[0]                  # (trg_len, E)  embedded tokens
        enc = enc_ref[0]              # (src_len, E)  encoder output
        trg_bias = trg_bias_ref[0]    # (trg_len, trg_len), shared over batch
        src_bias = src_bias_ref[0]    # (trg_len, src_len), per batch element

        for l in range(num_layers):               # static unrolled layer loop
            # DecoderBlock: masked self-attention + LayerNorm (residual = h)
            q = attention(h, h, trg_bias,
                          wq_sa_ref[l], wk_sa_ref[l], wv_sa_ref[l],
                          wfc_sa_ref[l], bfc_sa_ref[l],
                          g_sa_ref[l], bt_sa_ref[l])
            # TransformerBlock: cross-attention + LayerNorm (residual = q)
            a = attention(q, enc, src_bias,
                          wq_ca_ref[l], wk_ca_ref[l], wv_ca_ref[l],
                          wfc_ca_ref[l], bfc_ca_ref[l],
                          g_ca_ref[l], bt_ca_ref[l])
            # Feed-forward (Linear-ReLU-Linear) + residual + LayerNorm
            ff = jnp.maximum(mm(a, w1_ref[l]) + b1_ref[l], jnp.float32(0.0))
            z = mm(ff, w2_ref[l]) + b2_ref[l] + a
            h = layer_norm(z, g_ff_ref[l], bt_ff_ref[l])

        # Final vocab projection fused: the only HBM store is this
        # lane-dense (trg_len, vocab) block.
        out_ref[0] = mm(h, wout_ref[...]) + bout_ref[...]

    return kernel


def decoder_forward(tokens, enc_out, src_mask, trg_mask, params, *,
                    embed_size, heads, use_bf16=False):
    """Full Decoder forward (eval mode: dropout == identity)."""
    N, trg_len = tokens.shape
    src_len = enc_out.shape[1]
    E = embed_size
    head_dim = E // heads
    num_layers = params["wq_sa"].shape[0]
    vocab = params["w_out_t"].shape[1]
    inv_scale = 1.0 / math.sqrt(float(E))

    # TODO(synk): nn.Embedding gathers (data-dependent row fetch) stay in the
    # wrapper via jnp.take rather than a Pallas DMA-gather kernel.
    positions = jnp.arange(trg_len)
    x = (jnp.take(params["word_emb"], tokens, axis=0)
         + params["pos_emb"][positions][None]).astype(jnp.float32)

    # Additive f32 mask biases.  The reference masked-fills with -1e20 BEFORE
    # dividing by sqrt(E); the kernel folds 1/sqrt(E) into q, so the fill
    # value is pre-scaled.  (Assumes no query row is fully masked; an
    # all-masked row degrades to a uniform softmax in both kernel and ref.)
    neg = jnp.float32(-1e20 * inv_scale)
    # Causal target bias is batch-invariant -> pass once, shared via index_map.
    trg_bias = jnp.where(
        jnp.broadcast_to(trg_mask[0, 0], (trg_len, trg_len)) == 0,
        neg, jnp.float32(0.0))[None]                      # (1, q, q)
    # Source padding bias differs per batch element.
    src_bias = jnp.where(
        jnp.broadcast_to(src_mask[:, 0], (N, trg_len, src_len)) == 0,
        neg, jnp.float32(0.0))                            # (N, q, k)

    weight_args = (
        params["wq_sa"], params["wk_sa"], params["wv_sa"], params["wfc_sa"],
        params["bfc_sa"], params["g_sa"], params["bt_sa"],
        params["wq_ca"], params["wk_ca"], params["wv_ca"], params["wfc_ca"],
        params["bfc_ca"], params["g_ca"], params["bt_ca"],
        params["w1"], params["b1"], params["w2"], params["b2"],
        params["g_ff"], params["bt_ff"],
        params["w_out_t"], params["b_out"],
    )

    def full_spec(a):
        # Whole-array, grid-invariant block (weights / biases / LN params).
        # TODO(synk): when scaling E, mark these pipeline_mode=pl.Buffered(1)
        # (or stage into scratch) so invariant weights are not double-buffered
        # in v7x's 64 MiB VMEM.
        nd = a.ndim
        return pl.BlockSpec(a.shape, lambda n, _nd=nd: (0,) * _nd)

    kernel = _make_decoder_kernel(heads=heads, head_dim=head_dim,
                                  embed_size=E, num_layers=num_layers,
                                  use_bf16=use_bf16)

    return pl.pallas_call(
        kernel,
        out_shape=jax.ShapeDtypeStruct((N, trg_len, vocab), jnp.float32),
        grid_spec=pltpu.PrefetchScalarGridSpec(
            num_scalar_prefetch=0,
            grid=(N,),   # single "parallel" axis: v7x splits batch over 2 TCs
            in_specs=[
                pl.BlockSpec((1, trg_len, E), lambda n: (n, 0, 0)),
                pl.BlockSpec((1, src_len, E), lambda n: (n, 0, 0)),
                pl.BlockSpec((1, trg_len, trg_len), lambda n: (0, 0, 0)),
                pl.BlockSpec((1, trg_len, src_len), lambda n: (n, 0, 0)),
            ] + [full_spec(a) for a in weight_args],
            out_specs=pl.BlockSpec((1, trg_len, vocab), lambda n: (n, 0, 0)),
        ),
        compiler_params=pltpu.CompilerParams(
            dimension_semantics=("parallel",)),
    )(x, enc_out, trg_bias, src_bias, *weight_args)


# ---------------------------------------------------------------------------
# Parameter init (PyTorch-default-like) and kernel-layout preparation
# ---------------------------------------------------------------------------
def _uinit(key, shape, fan_in):
    b = 1.0 / math.sqrt(fan_in)
    return jax.random.uniform(key, shape, jnp.float32, minval=-b, maxval=b)


def init_raw_params(key, *, vocab, embed_size, heads, num_layers,
                    forward_expansion, max_length):
    hd = embed_size // heads
    hidden = forward_expansion * embed_size
    keys = jax.random.split(key, 3 + num_layers)
    word_emb = jax.random.normal(keys[0], (vocab, embed_size), jnp.float32)
    pos_emb = jax.random.normal(keys[1], (max_length, embed_size), jnp.float32)
    ko1, ko2 = jax.random.split(keys[2])
    w_out = _uinit(ko1, (vocab, embed_size), embed_size)
    b_out = _uinit(ko2, (vocab,), embed_size)

    def ln_params():
        return {"gamma": jnp.ones((embed_size,), jnp.float32),
                "beta": jnp.zeros((embed_size,), jnp.float32)}

    def attn_params(ks):
        return {"wv": _uinit(ks[0], (hd, hd), hd),
                "wk": _uinit(ks[1], (hd, hd), hd),
                "wq": _uinit(ks[2], (hd, hd), hd),
                "wfc": _uinit(ks[3], (embed_size, embed_size), embed_size),
                "bfc": _uinit(ks[4], (embed_size,), embed_size)}

    layers = []
    for i in range(num_layers):
        lk = jax.random.split(keys[3 + i], 14)
        layers.append({
            "self_attn": attn_params(lk[0:5]),
            "norm": ln_params(),
            "tb_attn": attn_params(lk[5:10]),
            "tb_norm1": ln_params(),
            "tb_norm2": ln_params(),
            "ff_w1": _uinit(lk[10], (hidden, embed_size), embed_size),
            "ff_b1": _uinit(lk[11], (hidden,), embed_size),
            "ff_w2": _uinit(lk[12], (embed_size, hidden), hidden),
            "ff_b2": _uinit(lk[13], (embed_size,), hidden),
        })
    return {"word_emb": word_emb, "pos_emb": pos_emb,
            "w_out": w_out, "b_out": b_out, "layers": layers}


def _block_diag_T(w, heads):
    """Block-diagonal matrix with W^T on the diagonal: batches the shared
    per-head Linear(head_dim, head_dim, bias=False) into one (E,E) matmul."""
    hd = w.shape[0]
    E = heads * hd
    bd = jnp.zeros((E, E), dtype=w.dtype)
    wt = w.T
    for h in range(heads):
        bd = bd.at[h * hd:(h + 1) * hd, h * hd:(h + 1) * hd].set(wt)
    return bd


def prepare_decoder_params(raw, heads):
    """Stack per-layer weights along a leading layer axis (kernel layout)."""
    E = raw["word_emb"].shape[1]

    def stack(fn):
        return jnp.stack([fn(lp) for lp in raw["layers"]], axis=0)

    return {
        "word_emb": raw["word_emb"],
        "pos_emb": raw["pos_emb"],
        "w_out_t": raw["w_out"].T,
        "b_out": raw["b_out"].reshape(1, -1),
        # self-attention (DecoderBlock.attention) + its LayerNorm
        "wq_sa": stack(lambda lp: _block_diag_T(lp["self_attn"]["wq"], heads)),
        "wk_sa": stack(lambda lp: _block_diag_T(lp["self_attn"]["wk"], heads)),
        "wv_sa": stack(lambda lp: _block_diag_T(lp["self_attn"]["wv"], heads)),
        "wfc_sa": stack(lambda lp: lp["self_attn"]["wfc"].T),
        "bfc_sa": stack(lambda lp: lp["self_attn"]["bfc"].reshape(1, E)),
        "g_sa": stack(lambda lp: lp["norm"]["gamma"].reshape(1, E)),
        "bt_sa": stack(lambda lp: lp["norm"]["beta"].reshape(1, E)),
        # cross-attention (TransformerBlock.attention) + norm1
        "wq_ca": stack(lambda lp: _block_diag_T(lp["tb_attn"]["wq"], heads)),
        "wk_ca": stack(lambda lp: _block_diag_T(lp["tb_attn"]["wk"], heads)),
        "wv_ca": stack(lambda lp: _block_diag_T(lp["tb_attn"]["wv"], heads)),
        "wfc_ca": stack(lambda lp: lp["tb_attn"]["wfc"].T),
        "bfc_ca": stack(lambda lp: lp["tb_attn"]["bfc"].reshape(1, E)),
        "g_ca": stack(lambda lp: lp["tb_norm1"]["gamma"].reshape(1, E)),
        "bt_ca": stack(lambda lp: lp["tb_norm1"]["beta"].reshape(1, E)),
        # feed-forward + norm2
        "w1": stack(lambda lp: lp["ff_w1"].T),
        "b1": stack(lambda lp: lp["ff_b1"].reshape(1, -1)),
        "w2": stack(lambda lp: lp["ff_w2"].T),
        "b2": stack(lambda lp: lp["ff_b2"].reshape(1, -1)),
        "g_ff": stack(lambda lp: lp["tb_norm2"]["gamma"].reshape(1, E)),
        "bt_ff": stack(lambda lp: lp["tb_norm2"]["beta"].reshape(1, E)),
    }


# ---------------------------------------------------------------------------
# Pure-JAX reference (faithful to the PyTorch module, eval mode)
# ---------------------------------------------------------------------------
def _self_attention_ref(values, keys, query, mask, p, *, embed_size, heads):
    hd = embed_size // heads
    N, v_len, _ = values.shape
    k_len, q_len = keys.shape[1], query.shape[1]
    v = values.reshape(N, v_len, heads, hd) @ p["wv"].T
    k = keys.reshape(N, k_len, heads, hd) @ p["wk"].T
    q = query.reshape(N, q_len, heads, hd) @ p["wq"].T
    energy = jnp.einsum("nqhd,nkhd->nhqk", q, k)
    energy = jnp.where(mask == 0, jnp.float32(-1e20), energy)
    attn = jax.nn.softmax(energy / math.sqrt(embed_size), axis=3)
    out = jnp.einsum("nhql,nlhd->nqhd", attn, v).reshape(N, q_len, embed_size)
    return out @ p["wfc"].T + p["bfc"]


def _layer_norm_ref(x, gamma, beta, eps=_LN_EPS):
    mu = jnp.mean(x, axis=-1, keepdims=True)
    var = jnp.mean((x - mu) ** 2, axis=-1, keepdims=True)
    return (x - mu) / jnp.sqrt(var + eps) * gamma + beta


def decoder_ref(tokens, enc_out, src_mask, trg_mask, raw, *, embed_size, heads):
    N, L = tokens.shape
    pos = jnp.arange(L)
    x = raw["word_emb"][tokens] + raw["pos_emb"][pos][None]
    for lp in raw["layers"]:
        attn = _self_attention_ref(x, x, x, trg_mask, lp["self_attn"],
                                   embed_size=embed_size, heads=heads)
        q = _layer_norm_ref(attn + x, lp["norm"]["gamma"], lp["norm"]["beta"])
        attn2 = _self_attention_ref(enc_out, enc_out, q, src_mask,
                                    lp["tb_attn"],
                                    embed_size=embed_size, heads=heads)
        h = _layer_norm_ref(attn2 + q, lp["tb_norm1"]["gamma"],
                            lp["tb_norm1"]["beta"])
        ff = (jnp.maximum(h @ lp["ff_w1"].T + lp["ff_b1"], 0.0)
              @ lp["ff_w2"].T + lp["ff_b2"])
        x = _layer_norm_ref(ff + h, lp["tb_norm2"]["gamma"],
                            lp["tb_norm2"]["beta"])
    return x @ raw["w_out"].T + raw["b_out"]


# ---------------------------------------------------------------------------
# Main
# ---------------------------------------------------------------------------
if __name__ == "__main__":
    vocab = 128           # lane-dense final output
    embed_size = 32
    heads = 2
    num_layers = 2
    forward_expansion = 4
    max_length = 16
    N = 2
    trg_len = 8
    src_len = 8

    root = jax.random.PRNGKey(0)
    k_tok, k_enc, k_par = jax.random.split(root, 3)

    tokens = jax.random.randint(k_tok, (N, trg_len), 0, vocab, dtype=jnp.int32)
    enc_out = jax.random.normal(k_enc, (N, src_len, embed_size),
                                dtype=jnp.float32)

    # Causal target mask (N, 1, trg_len, trg_len)
    trg_mask = jnp.broadcast_to(
        jnp.tril(jnp.ones((trg_len, trg_len), dtype=jnp.int32))[None, None],
        (N, 1, trg_len, trg_len)).astype(jnp.int32)
    # Source padding mask (N, 1, 1, src_len): batch 1 masks last two positions
    src_keep = jnp.array([[1] * src_len,
                          [1] * (src_len - 2) + [0, 0]], dtype=jnp.int32)
    src_mask = src_keep[:, None, None, :]

    raw = init_raw_params(k_par, vocab=vocab, embed_size=embed_size,
                          heads=heads, num_layers=num_layers,
                          forward_expansion=forward_expansion,
                          max_length=max_length)
    kparams = prepare_decoder_params(raw, heads)

    # use_bf16=False keeps exact f32 parity; set True on v6e/v7x for the fast
    # MXU path (accumulation stays f32), relaxing the tolerance accordingly.
    fwd = jax.jit(partial(decoder_forward, embed_size=embed_size, heads=heads,
                          use_bf16=False))
    out = jax.block_until_ready(fwd(tokens, enc_out, src_mask, trg_mask,
                                    kparams))

    ref = decoder_ref(tokens, enc_out, src_mask, trg_mask, raw,
                      embed_size=embed_size, heads=heads)

    assert out.shape == (N, trg_len, vocab)
    assert jnp.allclose(out, ref, atol=1e-3, rtol=1e-3), (
        "mismatch vs reference: max |diff| = %g"
        % float(jnp.max(jnp.abs(out - ref))))

    print("KERNEL_OK")
</pallas_src>

<mosaic_0001>
module attributes {stable_mosaic.version = 11 : i64} {
  func.func @kernel(%arg0: i32, %arg1: memref<1x8x32xf32, #tpu.memory_space<vmem>>, %arg2: memref<1x8x32xf32, #tpu.memory_space<vmem>>, %arg3: memref<1x8x8xf32, #tpu.memory_space<vmem>>, %arg4: memref<1x8x8xf32, #tpu.memory_space<vmem>>, %arg5: memref<2x32x32xf32, #tpu.memory_space<vmem>>, %arg6: memref<2x32x32xf32, #tpu.memory_space<vmem>>, %arg7: memref<2x32x32xf32, #tpu.memory_space<vmem>>, %arg8: memref<2x32x32xf32, #tpu.memory_space<vmem>>, %arg9: memref<2x1x32xf32, #tpu.memory_space<vmem>>, %arg10: memref<2x1x32xf32, #tpu.memory_space<vmem>>, %arg11: memref<2x1x32xf32, #tpu.memory_space<vmem>>, %arg12: memref<2x32x32xf32, #tpu.memory_space<vmem>>, %arg13: memref<2x32x32xf32, #tpu.memory_space<vmem>>, %arg14: memref<2x32x32xf32, #tpu.memory_space<vmem>>, %arg15: memref<2x32x32xf32, #tpu.memory_space<vmem>>, %arg16: memref<2x1x32xf32, #tpu.memory_space<vmem>>, %arg17: memref<2x1x32xf32, #tpu.memory_space<vmem>>, %arg18: memref<2x1x32xf32, #tpu.memory_space<vmem>>, %arg19: memref<2x32x128xf32, #tpu.memory_space<vmem>>, %arg20: memref<2x1x128xf32, #tpu.memory_space<vmem>>, %arg21: memref<2x128x32xf32, #tpu.memory_space<vmem>>, %arg22: memref<2x1x32xf32, #tpu.memory_space<vmem>>, %arg23: memref<2x1x32xf32, #tpu.memory_space<vmem>>, %arg24: memref<2x1x32xf32, #tpu.memory_space<vmem>>, %arg25: memref<32x128xf32, #tpu.memory_space<vmem>>, %arg26: memref<1x128xf32, #tpu.memory_space<vmem>>, %arg27: memref<1x8x128xf32, #tpu.memory_space<vmem>>) attributes {dimension_semantics = [#tpu.dimension_semantics<parallel>], iteration_bounds = array<i64: 2>, scalar_prefetch = 0 : i64, scratch_operands = 0 : i64, tpu.core_type = #tpu.core_type<tc>, window_params = [{transform_indices = @transform_0, window_bounds = array<i64: 1, 8, 32>}, {transform_indices = @transform_1, window_bounds = array<i64: 1, 8, 32>}, {pipeline_mode = #tpu.pipeline_mode<synchronous>, transform_indices = @transform_2, window_bounds = array<i64: 1, 8, 8>}, {transform_indices = @transform_3, window_bounds = array<i64: 1, 8, 8>}, {pipeline_mode = #tpu.pipeline_mode<synchronous>, transform_indices = @transform_4, window_bounds = array<i64: 2, 32, 32>}, {pipeline_mode = #tpu.pipeline_mode<synchronous>, transform_indices = @transform_5, window_bounds = array<i64: 2, 32, 32>}, {pipeline_mode = #tpu.pipeline_mode<synchronous>, transform_indices = @transform_6, window_bounds = array<i64: 2, 32, 32>}, {pipeline_mode = #tpu.pipeline_mode<synchronous>, transform_indices = @transform_7, window_bounds = array<i64: 2, 32, 32>}, {pipeline_mode = #tpu.pipeline_mode<synchronous>, transform_indices = @transform_8, window_bounds = array<i64: 2, 1, 32>}, {pipeline_mode = #tpu.pipeline_mode<synchronous>, transform_indices = @transform_9, window_bounds = array<i64: 2, 1, 32>}, {pipeline_mode = #tpu.pipeline_mode<synchronous>, transform_indices = @transform_10, window_bounds = array<i64: 2, 1, 32>}, {pipeline_mode = #tpu.pipeline_mode<synchronous>, transform_indices = @transform_11, window_bounds = array<i64: 2, 32, 32>}, {pipeline_mode = #tpu.pipeline_mode<synchronous>, transform_indices = @transform_12, window_bounds = array<i64: 2, 32, 32>}, {pipeline_mode = #tpu.pipeline_mode<synchronous>, transform_indices = @transform_13, window_bounds = array<i64: 2, 32, 32>}, {pipeline_mode = #tpu.pipeline_mode<synchronous>, transform_indices = @transform_14, window_bounds = array<i64: 2, 32, 32>}, {pipeline_mode = #tpu.pipeline_mode<synchronous>, transform_indices = @transform_15, window_bounds = array<i64: 2, 1, 32>}, {pipeline_mode = #tpu.pipeline_mode<synchronous>, transform_indices = @transform_16, window_bounds = array<i64: 2, 1, 32>}, {pipeline_mode = #tpu.pipeline_mode<synchronous>, transform_indices = @transform_17, window_bounds = array<i64: 2, 1, 32>}, {pipeline_mode = #tpu.pipeline_mode<synchronous>, transform_indices = @transform_18, window_bounds = array<i64: 2, 32, 128>}, {pipeline_mode = #tpu.pipeline_mode<synchronous>, transform_indices = @transform_19, window_bounds = array<i64: 2, 1, 128>}, {pipeline_mode = #tpu.pipeline_mode<synchronous>, transform_indices = @transform_20, window_bounds = array<i64: 2, 128, 32>}, {pipeline_mode = #tpu.pipeline_mode<synchronous>, transform_indices = @transform_21, window_bounds = array<i64: 2, 1, 32>}, {pipeline_mode = #tpu.pipeline_mode<synchronous>, transform_indices = @transform_22, window_bounds = array<i64: 2, 1, 32>}, {pipeline_mode = #tpu.pipeline_mode<synchronous>, transform_indices = @transform_23, window_bounds = array<i64: 2, 1, 32>}, {pipeline_mode = #tpu.pipeline_mode<synchronous>, transform_indices = @transform_24, window_bounds = array<i64: 32, 128>}, {pipeline_mode = #tpu.pipeline_mode<synchronous>, transform_indices = @transform_25, window_bounds = array<i64: 1, 128>}, {transform_indices = @transform_26, window_bounds = array<i64: 1, 8, 128>}]} {
    %c0 = arith.constant 0 : index
    %c0_0 = arith.constant 0 : index
    %c0_1 = arith.constant 0 : index
    %0 = vector.load %arg1[%c0, %c0_0, %c0_1] : memref<1x8x32xf32, #tpu.memory_space<vmem>>, vector<1x8x32xf32>
    %1 = vector.shape_cast %0 : vector<1x8x32xf32> to vector<8x32xf32>
    %c0_2 = arith.constant 0 : index
    %c0_3 = arith.constant 0 : index
    %c0_4 = arith.constant 0 : index
    %2 = vector.load %arg2[%c0_2, %c0_3, %c0_4] : memref<1x8x32xf32, #tpu.memory_space<vmem>>, vector<1x8x32xf32>
    %3 = vector.shape_cast %2 : vector<1x8x32xf32> to vector<8x32xf32>
    %c0_5 = arith.constant 0 : index
    %c0_6 = arith.constant 0 : index
    %c0_7 = arith.constant 0 : index
    %4 = vector.load %arg3[%c0_5, %c0_6, %c0_7] : memref<1x8x8xf32, #tpu.memory_space<vmem>>, vector<1x8x8xf32>
    %5 = vector.shape_cast %4 : vector<1x8x8xf32> to vector<8x8xf32>
    %c0_8 = arith.constant 0 : index
    %c0_9 = arith.constant 0 : index
    %c0_10 = arith.constant 0 : index
    %6 = vector.load %arg4[%c0_8, %c0_9, %c0_10] : memref<1x8x8xf32, #tpu.memory_space<vmem>>, vector<1x8x8xf32>
    %7 = vector.shape_cast %6 : vector<1x8x8xf32> to vector<8x8xf32>
    %c0_11 = arith.constant 0 : index
    %c0_12 = arith.constant 0 : index
    %c0_13 = arith.constant 0 : index
    %8 = vector.load %arg5[%c0_11, %c0_12, %c0_13] : memref<2x32x32xf32, #tpu.memory_space<vmem>>, vector<1x32x32xf32>
    %9 = vector.shape_cast %8 : vector<1x32x32xf32> to vector<32x32xf32>
    %c0_14 = arith.constant 0 : index
    %c0_15 = arith.constant 0 : index
    %c0_16 = arith.constant 0 : index
    %10 = vector.load %arg6[%c0_14, %c0_15, %c0_16] : memref<2x32x32xf32, #tpu.memory_space<vmem>>, vector<1x32x32xf32>
    %11 = vector.shape_cast %10 : vector<1x32x32xf32> to vector<32x32xf32>
    %c0_17 = arith.constant 0 : index
    %c0_18 = arith.constant 0 : index
    %c0_19 = arith.constant 0 : index
    %12 = vector.load %arg7[%c0_17, %c0_18, %c0_19] : memref<2x32x32xf32, #tpu.memory_space<vmem>>, vector<1x32x32xf32>
    %13 = vector.shape_cast %12 : vector<1x32x32xf32> to vector<32x32xf32>
    %c0_20 = arith.constant 0 : index
    %c0_21 = arith.constant 0 : index
    %c0_22 = arith.constant 0 : index
    %14 = vector.load %arg8[%c0_20, %c0_21, %c0_22] : memref<2x32x32xf32, #tpu.memory_space<vmem>>, vector<1x32x32xf32>
    %15 = vector.shape_cast %14 : vector<1x32x32xf32> to vector<32x32xf32>
    %c0_23 = arith.constant 0 : index
    %c0_24 = arith.constant 0 : index
    %c0_25 = arith.constant 0 : index
    %16 = vector.load %arg9[%c0_23, %c0_24, %c0_25] : memref<2x1x32xf32, #tpu.memory_space<vmem>>, vector<1x1x32xf32>
    %17 = vector.shape_cast %16 : vector<1x1x32xf32> to vector<1x32xf32>
    %c0_26 = arith.constant 0 : index
    %c0_27 = arith.constant 0 : index
    %c0_28 = arith.constant 0 : index
    %18 = vector.load %arg10[%c0_26, %c0_27, %c0_28] : memref<2x1x32xf32, #tpu.memory_space<vmem>>, vector<1x1x32xf32>
    %19 = vector.shape_cast %18 : vector<1x1x32xf32> to vector<1x32xf32>
    %c0_29 = arith.constant 0 : index
    %c0_30 = arith.constant 0 : index
    %c0_31 = arith.constant 0 : index
    %20 = vector.load %arg11[%c0_29, %c0_30, %c0_31] : memref<2x1x32xf32, #tpu.memory_space<vmem>>, vector<1x1x32xf32>
    %21 = vector.shape_cast %20 : vector<1x1x32xf32> to vector<1x32xf32>
    %cst = arith.constant dense<0.000000e+00> : vector<8x32xf32>
    %22 = tpu.matmul %1, %9, %cst {dimension_numbers = #tpu.dot_dimension_numbers<[1], [0], [0], [1], [0, 0, 1, 1], [], []>} : vector<8x32xf32>, vector<32x32xf32>, vector<8x32xf32> -> vector<8x32xf32>
    %cst_32 = arith.constant 0.176776692 : f32
    %23 = vector.broadcast %cst_32 : f32 to vector<8x32xf32>
    %24 = arith.mulf %22, %23 : vector<8x32xf32>
    %cst_33 = arith.constant dense<0.000000e+00> : vector<8x32xf32>
    %25 = tpu.matmul %1, %11, %cst_33 {dimension_numbers = #tpu.dot_dimension_numbers<[1], [0], [0], [1], [0, 0, 1, 1], [], []>} : vector<8x32xf32>, vector<32x32xf32>, vector<8x32xf32> -> vector<8x32xf32>
    %cst_34 = arith.constant dense<0.000000e+00> : vector<8x32xf32>
    %26 = tpu.matmul %1, %13, %cst_34 {dimension_numbers = #tpu.dot_dimension_numbers<[1], [0], [0], [1], [0, 0, 1, 1], [], []>} : vector<8x32xf32>, vector<32x32xf32>, vector<8x32xf32> -> vector<8x32xf32>
    %27 = vector.extract_strided_slice %24 {offsets = [0, 0], sizes = [8, 16], strides = [1, 1]} : vector<8x32xf32> to vector<8x16xf32>
    %28 = vector.extract_strided_slice %25 {offsets = [0, 0], sizes = [8, 16], strides = [1, 1]} : vector<8x32xf32> to vector<8x16xf32>
    %29 = vector.extract_strided_slice %26 {offsets = [0, 0], sizes = [8, 16], strides = [1, 1]} : vector<8x32xf32> to vector<8x16xf32>
    %cst_35 = arith.constant dense<0.000000e+00> : vector<8x8xf32>
    %30 = tpu.matmul %27, %28, %cst_35 {dimension_numbers = #tpu.dot_dimension_numbers<[1], [1], [0], [0], [0, 0, 1, 0], [], []>} : vector<8x16xf32>, vector<8x16xf32>, vector<8x8xf32> -> vector<8x8xf32>
    %31 = arith.addf %30, %5 : vector<8x8xf32>
    %cst_36 = arith.constant dense<0xFF800000> : vector<8xf32>
    %32 = vector.multi_reduction <maximumf>, %31, %cst_36 [1] : vector<8x8xf32> to vector<8xf32>
    %33 = vector.shape_cast %32 : vector<8xf32> to vector<8x1xf32>
    %34 = vector.broadcast %33 : vector<8x1xf32> to vector<8x8xf32>
    %35 = arith.subf %31, %34 : vector<8x8xf32>
    %36 = math.exp %35 : vector<8x8xf32>
    %cst_37 = arith.constant dense<0.000000e+00> : vector<8xf32>
    %37 = vector.multi_reduction <add>, %36, %cst_37 [1] : vector<8x8xf32> to vector<8xf32>
    %38 = vector.shape_cast %37 : vector<8xf32> to vector<8x1xf32>
    %39 = vector.broadcast %38 : vector<8x1xf32> to vector<8x8xf32>
    %40 = arith.divf %36, %39 : vector<8x8xf32>
    %cst_38 = arith.constant dense<0.000000e+00> : vector<8x16xf32>
    %41 = tpu.matmul %40, %29, %cst_38 {dimension_numbers = #tpu.dot_dimension_numbers<[1], [0], [0], [1], [0, 0, 1, 1], [], []>} : vector<8x8xf32>, vector<8x16xf32>, vector<8x16xf32> -> vector<8x16xf32>
    %42 = vector.extract_strided_slice %15 {offsets = [0, 0], sizes = [16, 32], strides = [1, 1]} : vector<32x32xf32> to vector<16x32xf32>
    %cst_39 = arith.constant dense<0.000000e+00> : vector<8x32xf32>
    %43 = tpu.matmul %41, %42, %cst_39 {dimension_numbers = #tpu.dot_dimension_numbers<[1], [0], [0], [1], [0, 0, 1, 1], [], []>} : vector<8x16xf32>, vector<16x32xf32>, vector<8x32xf32> -> vector<8x32xf32>
    %44 = vector.extract_strided_slice %24 {offsets = [0, 16], sizes = [8, 16], strides = [1, 1]} : vector<8x32xf32> to vector<8x16xf32>
    %45 = vector.extract_strided_slice %25 {offsets = [0, 16], sizes = [8, 16], strides = [1, 1]} : vector<8x32xf32> to vector<8x16xf32>
    %46 = vector.extract_strided_slice %26 {offsets = [0, 16], sizes = [8, 16], strides = [1, 1]} : vector<8x32xf32> to vector<8x16xf32>
    %cst_40 = arith.constant dense<0.000000e+00> : vector<8x8xf32>
    %47 = tpu.matmul %44, %45, %cst_40 {dimension_numbers = #tpu.dot_dimension_numbers<[1], [1], [0], [0], [0, 0, 1, 0], [], []>} : vector<8x16xf32>, vector<8x16xf32>, vector<8x8xf32> -> vector<8x8xf32>
    %48 = arith.addf %47, %5 : vector<8x8xf32>
    %cst_41 = arith.constant dense<0xFF800000> : vector<8xf32>
    %49 = vector.multi_reduction <maximumf>, %48, %cst_41 [1] : vector<8x8xf32> to vector<8xf32>
    %50 = vector.shape_cast %49 : vector<8xf32> to vector<8x1xf32>
    %51 = vector.broadcast %50 : vector<8x1xf32> to vector<8x8xf32>
    %52 = arith.subf %48, %51 : vector<8x8xf32>
    %53 = math.exp %52 : vector<8x8xf32>
    %cst_42 = arith.constant dense<0.000000e+00> : vector<8xf32>
    %54 = vector.multi_reduction <add>, %53, %cst_42 [1] : vector<8x8xf32> to vector<8xf32>
    %55 = vector.shape_cast %54 : vector<8xf32> to vector<8x1xf32>
    %56 = vector.broadcast %55 : vector<8x1xf32> to vector<8x8xf32>
    %57 = arith.divf %53, %56 : vector<8x8xf32>
    %cst_43 = arith.constant dense<0.000000e+00> : vector<8x16xf32>
    %58 = tpu.matmul %57, %46, %cst_43 {dimension_numbers = #tpu.dot_dimension_numbers<[1], [0], [0], [1], [0, 0, 1, 1], [], []>} : vector<8x8xf32>, vector<8x16xf32>, vector<8x16xf32> -> vector<8x16xf32>
    %59 = vector.extract_strided_slice %15 {offsets = [16, 0], sizes = [16, 32], strides = [1, 1]} : vector<32x32xf32> to vector<16x32xf32>
    %cst_44 = arith.constant dense<0.000000e+00> : vector<8x32xf32>
    %60 = tpu.matmul %58, %59, %cst_44 {dimension_numbers = #tpu.dot_dimension_numbers<[1], [0], [0], [1], [0, 0, 1, 1], [], []>} : vector<8x16xf32>, vector<16x32xf32>, vector<8x32xf32> -> vector<8x32xf32>
    %61 = arith.addf %43, %60 : vector<8x32xf32>
    %62 = vector.broadcast %17 : vector<1x32xf32> to vector<8x32xf32>
    %63 = arith.addf %61, %62 : vector<8x32xf32>
    %64 = arith.addf %63, %1 : vector<8x32xf32>
    %cst_45 = arith.constant dense<0.000000e+00> : vector<8xf32>
    %65 = vector.multi_reduction <add>, %64, %cst_45 [1] : vector<8x32xf32> to vector<8xf32>
    %66 = vector.shape_cast %65 : vector<8xf32> to vector<8x1xf32>
    %cst_46 = arith.constant 3.200000e+01 : f32
    %67 = vector.broadcast %cst_46 : f32 to vector<8x1xf32>
    %68 = arith.divf %66, %67 : vector<8x1xf32>
    %69 = vector.broadcast %68 : vector<8x1xf32> to vector<8x32xf32>
    %70 = arith.subf %64, %69 : vector<8x32xf32>
    %71 = arith.mulf %70, %70 : vector<8x32xf32>
    %cst_47 = arith.constant dense<0.000000e+00> : vector<8xf32>
    %72 = vector.multi_reduction <add>, %71, %cst_47 [1] : vector<8x32xf32> to vector<8xf32>
    %73 = vector.shape_cast %72 : vector<8xf32> to vector<8x1xf32>
    %cst_48 = arith.constant 3.200000e+01 : f32
    %74 = vector.broadcast %cst_48 : f32 to vector<8x1xf32>
    %75 = arith.divf %73, %74 : vector<8x1xf32>
    %cst_49 = arith.constant 9.99999974E-6 : f32
    %76 = vector.broadcast %cst_49 : f32 to vector<8x1xf32>
    %77 = arith.addf %75, %76 : vector<8x1xf32>
    %78 = math.rsqrt %77 : vector<8x1xf32>
    %79 = vector.broadcast %78 : vector<8x1xf32> to vector<8x32xf32>
    %80 = arith.mulf %70, %79 : vector<8x32xf32>
    %81 = vector.broadcast %19 : vector<1x32xf32> to vector<8x32xf32>
    %82 = arith.mulf %80, %81 : vector<8x32xf32>
    %83 = vector.broadcast %21 : vector<1x32xf32> to vector<8x32xf32>
    %84 = arith.addf %82, %83 : vector<8x32xf32>
    %c0_50 = arith.constant 0 : index
    %c0_51 = arith.constant 0 : index
    %c0_52 = arith.constant 0 : index
    %85 = vector.load %arg12[%c0_50, %c0_51, %c0_52] : memref<2x32x32xf32, #tpu.memory_space<vmem>>, vector<1x32x32xf32>
    %86 = vector.shape_cast %85 : vector<1x32x32xf32> to vector<32x32xf32>
    %c0_53 = arith.constant 0 : index
    %c0_54 = arith.constant 0 : index
    %c0_55 = arith.constant 0 : index
    %87 = vector.load %arg13[%c0_53, %c0_54, %c0_55] : memref<2x32x32xf32, #tpu.memory_space<vmem>>, vector<1x32x32xf32>
    %88 = vector.shape_cast %87 : vector<1x32x32xf32> to vector<32x32xf32>
    %c0_56 = arith.constant 0 : index
    %c0_57 = arith.constant 0 : index
    %c0_58 = arith.constant 0 : index
    %89 = vector.load %arg14[%c0_56, %c0_57, %c0_58] : memref<2x32x32xf32, #tpu.memory_space<vmem>>, vector<1x32x32xf32>
    %90 = vector.shape_cast %89 : vector<1x32x32xf32> to vector<32x32xf32>
    %c0_59 = arith.constant 0 : index
    %c0_60 = arith.constant 0 : index
    %c0_61 = arith.constant 0 : index
    %91 = vector.load %arg15[%c0_59, %c0_60, %c0_61] : memref<2x32x32xf32, #tpu.memory_space<vmem>>, vector<1x32x32xf32>
    %92 = vector.shape_cast %91 : vector<1x32x32xf32> to vector<32x32xf32>
    %c0_62 = arith.constant 0 : index
    %c0_63 = arith.constant 0 : index
    %c0_64 = arith.constant 0 : index
    %93 = vector.load %arg16[%c0_62, %c0_63, %c0_64] : memref<2x1x32xf32, #tpu.memory_space<vmem>>, vector<1x1x32xf32>
    %94 = vector.shape_cast %93 : vector<1x1x32xf32> to vector<1x32xf32>
    %c0_65 = arith.constant 0 : index
    %c0_66 = arith.constant 0 : index
    %c0_67 = arith.constant 0 : index
    %95 = vector.load %arg17[%c0_65, %c0_66, %c0_67] : memref<2x1x32xf32, #tpu.memory_space<vmem>>, vector<1x1x32xf32>
    %96 = vector.shape_cast %95 : vector<1x1x32xf32> to vector<1x32xf32>
    %c0_68 = arith.constant 0 : index
    %c0_69 = arith.constant 0 : index
    %c0_70 = arith.constant 0 : index
    %97 = vector.load %arg18[%c0_68, %c0_69, %c0_70] : memref<2x1x32xf32, #tpu.memory_space<vmem>>, vector<1x1x32xf32>
    %98 = vector.shape_cast %97 : vector<1x1x32xf32> to vector<1x32xf32>
    %cst_71 = arith.constant dense<0.000000e+00> : vector<8x32xf32>
    %99 = tpu.matmul %84, %86, %cst_71 {dimension_numbers = #tpu.dot_dimension_numbers<[1], [0], [0], [1], [0, 0, 1, 1], [], []>} : vector<8x32xf32>, vector<32x32xf32>, vector<8x32xf32> -> vector<8x32xf32>
    %cst_72 = arith.constant 0.176776692 : f32
    %100 = vector.broadcast %cst_72 : f32 to vector<8x32xf32>
    %101 = arith.mulf %99, %100 : vector<8x32xf32>
    %cst_73 = arith.constant dense<0.000000e+00> : vector<8x32xf32>
    %102 = tpu.matmul %3, %88, %cst_73 {dimension_numbers = #tpu.dot_dimension_numbers<[1], [0], [0], [1], [0, 0, 1, 1], [], []>} : vector<8x32xf32>, vector<32x32xf32>, vector<8x32xf32> -> vector<8x32xf32>
    %cst_74 = arith.constant dense<0.000000e+00> : vector<8x32xf32>
    %103 = tpu.matmul %3, %90, %cst_74 {dimension_numbers = #tpu.dot_dimension_numbers<[1], [0], [0], [1], [0, 0, 1, 1], [], []>} : vector<8x32xf32>, vector<32x32xf32>, vector<8x32xf32> -> vector<8x32xf32>
    %104 = vector.extract_strided_slice %101 {offsets = [0, 0], sizes = [8, 16], strides = [1, 1]} : vector<8x32xf32> to vector<8x16xf32>
    %105 = vector.extract_strided_slice %102 {offsets = [0, 0], sizes = [8, 16], strides = [1, 1]} : vector<8x32xf32> to vector<8x16xf32>
    %106 = vector.extract_strided_slice %103 {offsets = [0, 0], sizes = [8, 16], strides = [1, 1]} : vector<8x32xf32> to vector<8x16xf32>
    %cst_75 = arith.constant dense<0.000000e+00> : vector<8x8xf32>
    %107 = tpu.matmul %104, %105, %cst_75 {dimension_numbers = #tpu.dot_dimension_numbers<[1], [1], [0], [0], [0, 0, 1, 0], [], []>} : vector<8x16xf32>, vector<8x16xf32>, vector<8x8xf32> -> vector<8x8xf32>
    %108 = arith.addf %107, %7 : vector<8x8xf32>
    %cst_76 = arith.constant dense<0xFF800000> : vector<8xf32>
    %109 = vector.multi_reduction <maximumf>, %108, %cst_76 [1] : vector<8x8xf32> to vector<8xf32>
    %110 = vector.shape_cast %109 : vector<8xf32> to vector<8x1xf32>
    %111 = vector.broadcast %110 : vector<8x1xf32> to vector<8x8xf32>
    %112 = arith.subf %108, %111 : vector<8x8xf32>
    %113 = math.exp %112 : vector<8x8xf32>
    %cst_77 = arith.constant dense<0.000000e+00> : vector<8xf32>
    %114 = vector.multi_reduction <add>, %113, %cst_77 [1] : vector<8x8xf32> to vector<8xf32>
    %115 = vector.shape_cast %114 : vector<8xf32> to vector<8x1xf32>
    %116 = vector.broadcast %115 : vector<8x1xf32> to vector<8x8xf32>
    %117 = arith.divf %113, %116 : vector<8x8xf32>
    %cst_78 = arith.constant dense<0.000000e+00> : vector<8x16xf32>
    %118 = tpu.matmul %117, %106, %cst_78 {dimension_numbers = #tpu.dot_dimension_numbers<[1], [0], [0], [1], [0, 0, 1, 1], [], []>} : vector<8x8xf32>, vector<8x16xf32>, vector<8x16xf32> -> vector<8x16xf32>
    %119 = vector.extract_strided_slice %92 {offsets = [0, 0], sizes = [16, 32], strides = [1, 1]} : vector<32x32xf32> to vector<16x32xf32>
    %cst_79 = arith.constant dense<0.000000e+00> : vector<8x32xf32>
    %120 = tpu.matmul %118, %119, %cst_79 {dimension_numbers = #tpu.dot_dimension_numbers<[1], [0], [0], [1], [0, 0, 1, 1], [], []>} : vector<8x16xf32>, vector<16x32xf32>, vector<8x32xf32> -> vector<8x32xf32>
    %121 = vector.extract_strided_slice %101 {offsets = [0, 16], sizes = [8, 16], strides = [1, 1]} : vector<8x32xf32> to vector<8x16xf32>
    %122 = vector.extract_strided_slice %102 {offsets = [0, 16], sizes = [8, 16], strides = [1, 1]} : vector<8x32xf32> to vector<8x16xf32>
    %123 = vector.extract_strided_slice %103 {offsets = [0, 16], sizes = [8, 16], strides = [1, 1]} : vector<8x32xf32> to vector<8x16xf32>
    %cst_80 = arith.constant dense<0.000000e+00> : vector<8x8xf32>
    %124 = tpu.matmul %121, %122, %cst_80 {dimension_numbers = #tpu.dot_dimension_numbers<[1], [1], [0], [0], [0, 0, 1, 0], [], []>} : vector<8x16xf32>, vector<8x16xf32>, vector<8x8xf32> -> vector<8x8xf32>
    %125 = arith.addf %124, %7 : vector<8x8xf32>
    %cst_81 = arith.constant dense<0xFF800000> : vector<8xf32>
    %126 = vector.multi_reduction <maximumf>, %125, %cst_81 [1] : vector<8x8xf32> to vector<8xf32>
    %127 = vector.shape_cast %126 : vector<8xf32> to vector<8x1xf32>
    %128 = vector.broadcast %127 : vector<8x1xf32> to vector<8x8xf32>
    %129 = arith.subf %125, %128 : vector<8x8xf32>
    %130 = math.exp %129 : vector<8x8xf32>
    %cst_82 = arith.constant dense<0.000000e+00> : vector<8xf32>
    %131 = vector.multi_reduction <add>, %130, %cst_82 [1] : vector<8x8xf32> to vector<8xf32>
    %132 = vector.shape_cast %131 : vector<8xf32> to vector<8x1xf32>
    %133 = vector.broadcast %132 : vector<8x1xf32> to vector<8x8xf32>
    %134 = arith.divf %130, %133 : vector<8x8xf32>
    %cst_83 = arith.constant dense<0.000000e+00> : vector<8x16xf32>
    %135 = tpu.matmul %134, %123, %cst_83 {dimension_numbers = #tpu.dot_dimension_numbers<[1], [0], [0], [1], [0, 0, 1, 1], [], []>} : vector<8x8xf32>, vector<8x16xf32>, vector<8x16xf32> -> vector<8x16xf32>
    %136 = vector.extract_strided_slice %92 {offsets = [16, 0], sizes = [16, 32], strides = [1, 1]} : vector<32x32xf32> to vector<16x32xf32>
    %cst_84 = arith.constant dense<0.000000e+00> : vector<8x32xf32>
    %137 = tpu.matmul %135, %136, %cst_84 {dimension_numbers = #tpu.dot_dimension_numbers<[1], [0], [0], [1], [0, 0, 1, 1], [], []>} : vector<8x16xf32>, vector<16x32xf32>, vector<8x32xf32> -> vector<8x32xf32>
    %138 = arith.addf %120, %137 : vector<8x32xf32>
    %139 = vector.broadcast %94 : vector<1x32xf32> to vector<8x32xf32>
    %140 = arith.addf %138, %139 : vector<8x32xf32>
    %141 = arith.addf %140, %84 : vector<8x32xf32>
    %cst_85 = arith.constant dense<0.000000e+00> : vector<8xf32>
    %142 = vector.multi_reduction <add>, %141, %cst_85 [1] : vector<8x32xf32> to vector<8xf32>
    %143 = vector.shape_cast %142 : vector<8xf32> to vector<8x1xf32>
    %cst_86 = arith.constant 3.200000e+01 : f32
    %144 = vector.broadcast %cst_86 : f32 to vector<8x1xf32>
    %145 = arith.divf %143, %144 : vector<8x1xf32>
    %146 = vector.broadcast %145 : vector<8x1xf32> to vector<8x32xf32>
    %147 = arith.subf %141, %146 : vector<8x32xf32>
    %148 = arith.mulf %147, %147 : vector<8x32xf32>
    %cst_87 = arith.constant dense<0.000000e+00> : vector<8xf32>
    %149 = vector.multi_reduction <add>, %148, %cst_87 [1] : vector<8x32xf32> to vector<8xf32>
    %150 = vector.shape_cast %149 : vector<8xf32> to vector<8x1xf32>
    %cst_88 = arith.constant 3.200000e+01 : f32
    %151 = vector.broadcast %cst_88 : f32 to vector<8x1xf32>
    %152 = arith.divf %150, %151 : vector<8x1xf32>
    %cst_89 = arith.constant 9.99999974E-6 : f32
    %153 = vector.broadcast %cst_89 : f32 to vector<8x1xf32>
    %154 = arith.addf %152, %153 : vector<8x1xf32>
    %155 = math.rsqrt %154 : vector<8x1xf32>
    %156 = vector.broadcast %155 : vector<8x1xf32> to vector<8x32xf32>
    %157 = arith.mulf %147, %156 : vector<8x32xf32>
    %158 = vector.broadcast %96 : vector<1x32xf32> to vector<8x32xf32>
    %159 = arith.mulf %157, %158 : vector<8x32xf32>
    %160 = vector.broadcast %98 : vector<1x32xf32> to vector<8x32xf32>
    %161 = arith.addf %159, %160 : vector<8x32xf32>
    %c0_90 = arith.constant 0 : index
    %c0_91 = arith.constant 0 : index
    %c0_92 = arith.constant 0 : index
    %162 = vector.load %arg19[%c0_90, %c0_91, %c0_92] : memref<2x32x128xf32, #tpu.memory_space<vmem>>, vector<1x32x128xf32>
    %163 = vector.shape_cast %162 : vector<1x32x128xf32> to vector<32x128xf32>
    %cst_93 = arith.constant dense<0.000000e+00> : vector<8x128xf32>
    %164 = tpu.matmul %161, %163, %cst_93 {dimension_numbers = #tpu.dot_dimension_numbers<[1], [0], [0], [1], [0, 0, 1, 1], [], []>} : vector<8x32xf32>, vector<32x128xf32>, vector<8x128xf32> -> vector<8x128xf32>
    %c0_94 = arith.constant 0 : index
    %c0_95 = arith.constant 0 : index
    %c0_96 = arith.constant 0 : index
    %165 = vector.load %arg20[%c0_94, %c0_95, %c0_96] : memref<2x1x128xf32, #tpu.memory_space<vmem>>, vector<1x1x128xf32>
    %166 = vector.shape_cast %165 : vector<1x1x128xf32> to vector<1x128xf32>
    %167 = vector.broadcast %166 : vector<1x128xf32> to vector<8x128xf32>
    %168 = arith.addf %164, %167 : vector<8x128xf32>
    %cst_97 = arith.constant 0.000000e+00 : f32
    %169 = vector.broadcast %cst_97 : f32 to vector<8x128xf32>
    %170 = arith.maximumf %168, %169 : vector<8x128xf32>
    %c0_98 = arith.constant 0 : index
    %c0_99 = arith.constant 0 : index
    %c0_100 = arith.constant 0 : index
    %171 = vector.load %arg21[%c0_98, %c0_99, %c0_100] : memref<2x128x32xf32, #tpu.memory_space<vmem>>, vector<1x128x32xf32>
    %172 = vector.shape_cast %171 : vector<1x128x32xf32> to vector<128x32xf32>
    %cst_101 = arith.constant dense<0.000000e+00> : vector<8x32xf32>
    %173 = tpu.matmul %170, %172, %cst_101 {dimension_numbers = #tpu.dot_dimension_numbers<[1], [0], [0], [1], [0, 0, 1, 1], [], []>} : vector<8x128xf32>, vector<128x32xf32>, vector<8x32xf32> -> vector<8x32xf32>
    %c0_102 = arith.constant 0 : index
    %c0_103 = arith.constant 0 : index
    %c0_104 = arith.constant 0 : index
    %174 = vector.load %arg22[%c0_102, %c0_103, %c0_104] : memref<2x1x32xf32, #tpu.memory_space<vmem>>, vector<1x1x32xf32>
    %175 = vector.shape_cast %174 : vector<1x1x32xf32> to vector<1x32xf32>
    %176 = vector.broadcast %175 : vector<1x32xf32> to vector<8x32xf32>
    %177 = arith.addf %173, %176 : vector<8x32xf32>
    %178 = arith.addf %177, %161 : vector<8x32xf32>
    %c0_105 = arith.constant 0 : index
    %c0_106 = arith.constant 0 : index
    %c0_107 = arith.constant 0 : index
    %179 = vector.load %arg23[%c0_105, %c0_106, %c0_107] : memref<2x1x32xf32, #tpu.memory_space<vmem>>, vector<1x1x32xf32>
    %180 = vector.shape_cast %179 : vector<1x1x32xf32> to vector<1x32xf32>
    %c0_108 = arith.constant 0 : index
    %c0_109 = arith.constant 0 : index
    %c0_110 = arith.constant 0 : index
    %181 = vector.load %arg24[%c0_108, %c0_109, %c0_110] : memref<2x1x32xf32, #tpu.memory_space<vmem>>, vector<1x1x32xf32>
    %182 = vector.shape_cast %181 : vector<1x1x32xf32> to vector<1x32xf32>
    %cst_111 = arith.constant dense<0.000000e+00> : vector<8xf32>
    %183 = vector.multi_reduction <add>, %178, %cst_111 [1] : vector<8x32xf32> to vector<8xf32>
    %184 = vector.shape_cast %183 : vector<8xf32> to vector<8x1xf32>
    %cst_112 = arith.constant 3.200000e+01 : f32
    %185 = vector.broadcast %cst_112 : f32 to vector<8x1xf32>
    %186 = arith.divf %184, %185 : vector<8x1xf32>
    %187 = vector.broadcast %186 : vector<8x1xf32> to vector<8x32xf32>
    %188 = arith.subf %178, %187 : vector<8x32xf32>
    %189 = arith.mulf %188, %188 : vector<8x32xf32>
    %cst_113 = arith.constant dense<0.000000e+00> : vector<8xf32>
    %190 = vector.multi_reduction <add>, %189, %cst_113 [1] : vector<8x32xf32> to vector<8xf32>
    %191 = vector.shape_cast %190 : vector<8xf32> to vector<8x1xf32>
    %cst_114 = arith.constant 3.200000e+01 : f32
    %192 = vector.broadcast %cst_114 : f32 to vector<8x1xf32>
    %193 = arith.divf %191, %192 : vector<8x1xf32>
    %cst_115 = arith.constant 9.99999974E-6 : f32
    %194 = vector.broadcast %cst_115 : f32 to vector<8x1xf32>
    %195 = arith.addf %193, %194 : vector<8x1xf32>
    %196 = math.rsqrt %195 : vector<8x1xf32>
    %197 = vector.broadcast %196 : vector<8x1xf32> to vector<8x32xf32>
    %198 = arith.mulf %188, %197 : vector<8x32xf32>
    %199 = vector.broadcast %180 : vector<1x32xf32> to vector<8x32xf32>
    %200 = arith.mulf %198, %199 : vector<8x32xf32>
    %201 = vector.broadcast %182 : vector<1x32xf32> to vector<8x32xf32>
    %202 = arith.addf %200, %201 : vector<8x32xf32>
    %c1 = arith.constant 1 : index
    %c0_116 = arith.constant 0 : index
    %c0_117 = arith.constant 0 : index
    %203 = vector.load %arg5[%c1, %c0_116, %c0_117] : memref<2x32x32xf32, #tpu.memory_space<vmem>>, vector<1x32x32xf32>
    %204 = vector.shape_cast %203 : vector<1x32x32xf32> to vector<32x32xf32>
    %c1_118 = arith.constant 1 : index
    %c0_119 = arith.constant 0 : index
    %c0_120 = arith.constant 0 : index
    %205 = vector.load %arg6[%c1_118, %c0_119, %c0_120] : memref<2x32x32xf32, #tpu.memory_space<vmem>>, vector<1x32x32xf32>
    %206 = vector.shape_cast %205 : vector<1x32x32xf32> to vector<32x32xf32>
    %c1_121 = arith.constant 1 : index
    %c0_122 = arith.constant 0 : index
    %c0_123 = arith.constant 0 : index
    %207 = vector.load %arg7[%c1_121, %c0_122, %c0_123] : memref<2x32x32xf32, #tpu.memory_space<vmem>>, vector<1x32x32xf32>
    %208 = vector.shape_cast %207 : vector<1x32x32xf32> to vector<32x32xf32>
    %c1_124 = arith.constant 1 : index
    %c0_125 = arith.constant 0 : index
    %c0_126 = arith.constant 0 : index
    %209 = vector.load %arg8[%c1_124, %c0_125, %c0_126] : memref<2x32x32xf32, #tpu.memory_space<vmem>>, vector<1x32x32xf32>
    %210 = vector.shape_cast %209 : vector<1x32x32xf32> to vector<32x32xf32>
    %c1_127 = arith.constant 1 : index
    %c0_128 = arith.constant 0 : index
    %c0_129 = arith.constant 0 : index
    %211 = vector.load %arg9[%c1_127, %c0_128, %c0_129] : memref<2x1x32xf32, #tpu.memory_space<vmem>>, vector<1x1x32xf32>
    %212 = vector.shape_cast %211 : vector<1x1x32xf32> to vector<1x32xf32>
    %c1_130 = arith.constant 1 : index
    %c0_131 = arith.constant 0 : index
    %c0_132 = arith.constant 0 : index
    %213 = vector.load %arg10[%c1_130, %c0_131, %c0_132] : memref<2x1x32xf32, #tpu.memory_space<vmem>>, vector<1x1x32xf32>
    %214 = vector.shape_cast %213 : vector<1x1x32xf32> to vector<1x32xf32>
    %c1_133 = arith.constant 1 : index
    %c0_134 = arith.constant 0 : index
    %c0_135 = arith.constant 0 : index
    %215 = vector.load %arg11[%c1_133, %c0_134, %c0_135] : memref<2x1x32xf32, #tpu.memory_space<vmem>>, vector<1x1x32xf32>
    %216 = vector.shape_cast %215 : vector<1x1x32xf32> to vector<1x32xf32>
    %cst_136 = arith.constant dense<0.000000e+00> : vector<8x32xf32>
    %217 = tpu.matmul %202, %204, %cst_136 {dimension_numbers = #tpu.dot_dimension_numbers<[1], [0], [0], [1], [0, 0, 1, 1], [], []>} : vector<8x32xf32>, vector<32x32xf32>, vector<8x32xf32> -> vector<8x32xf32>
    %cst_137 = arith.constant 0.176776692 : f32
    %218 = vector.broadcast %cst_137 : f32 to vector<8x32xf32>
    %219 = arith.mulf %217, %218 : vector<8x32xf32>
    %cst_138 = arith.constant dense<0.000000e+00> : vector<8x32xf32>
    %220 = tpu.matmul %202, %206, %cst_138 {dimension_numbers = #tpu.dot_dimension_numbers<[1], [0], [0], [1], [0, 0, 1, 1], [], []>} : vector<8x32xf32>, vector<32x32xf32>, vector<8x32xf32> -> vector<8x32xf32>
    %cst_139 = arith.constant dense<0.000000e+00> : vector<8x32xf32>
    %221 = tpu.matmul %202, %208, %cst_139 {dimension_numbers = #tpu.dot_dimension_numbers<[1], [0], [0], [1], [0, 0, 1, 1], [], []>} : vector<8x32xf32>, vector<32x32xf32>, vector<8x32xf32> -> vector<8x32xf32>
    %222 = vector.extract_strided_slice %219 {offsets = [0, 0], sizes = [8, 16], strides = [1, 1]} : vector<8x32xf32> to vector<8x16xf32>
    %223 = vector.extract_strided_slice %220 {offsets = [0, 0], sizes = [8, 16], strides = [1, 1]} : vector<8x32xf32> to vector<8x16xf32>
    %224 = vector.extract_strided_slice %221 {offsets = [0, 0], sizes = [8, 16], strides = [1, 1]} : vector<8x32xf32> to vector<8x16xf32>
    %cst_140 = arith.constant dense<0.000000e+00> : vector<8x8xf32>
    %225 = tpu.matmul %222, %223, %cst_140 {dimension_numbers = #tpu.dot_dimension_numbers<[1], [1], [0], [0], [0, 0, 1, 0], [], []>} : vector<8x16xf32>, vector<8x16xf32>, vector<8x8xf32> -> vector<8x8xf32>
    %226 = arith.addf %225, %5 : vector<8x8xf32>
    %cst_141 = arith.constant dense<0xFF800000> : vector<8xf32>
    %227 = vector.multi_reduction <maximumf>, %226, %cst_141 [1] : vector<8x8xf32> to vector<8xf32>
    %228 = vector.shape_cast %227 : vector<8xf32> to vector<8x1xf32>
    %229 = vector.broadcast %228 : vector<8x1xf32> to vector<8x8xf32>
    %230 = arith.subf %226, %229 : vector<8x8xf32>
    %231 = math.exp %230 : vector<8x8xf32>
    %cst_142 = arith.constant dense<0.000000e+00> : vector<8xf32>
    %232 = vector.multi_reduction <add>, %231, %cst_142 [1] : vector<8x8xf32> to vector<8xf32>
    %233 = vector.shape_cast %232 : vector<8xf32> to vector<8x1xf32>
    %234 = vector.broadcast %233 : vector<8x1xf32> to vector<8x8xf32>
    %235 = arith.divf %231, %234 : vector<8x8xf32>
    %cst_143 = arith.constant dense<0.000000e+00> : vector<8x16xf32>
    %236 = tpu.matmul %235, %224, %cst_143 {dimension_numbers = #tpu.dot_dimension_numbers<[1], [0], [0], [1], [0, 0, 1, 1], [], []>} : vector<8x8xf32>, vector<8x16xf32>, vector<8x16xf32> -> vector<8x16xf32>
    %237 = vector.extract_strided_slice %210 {offsets = [0, 0], sizes = [16, 32], strides = [1, 1]} : vector<32x32xf32> to vector<16x32xf32>
    %cst_144 = arith.constant dense<0.000000e+00> : vector<8x32xf32>
    %238 = tpu.matmul %236, %237, %cst_144 {dimension_numbers = #tpu.dot_dimension_numbers<[1], [0], [0], [1], [0, 0, 1, 1], [], []>} : vector<8x16xf32>, vector<16x32xf32>, vector<8x32xf32> -> vector<8x32xf32>
    %239 = vector.extract_strided_slice %219 {offsets = [0, 16], sizes = [8, 16], strides = [1, 1]} : vector<8x32xf32> to vector<8x16xf32>
    %240 = vector.extract_strided_slice %220 {offsets = [0, 16], sizes = [8, 16], strides = [1, 1]} : vector<8x32xf32> to vector<8x16xf32>
    %241 = vector.extract_strided_slice %221 {offsets = [0, 16], sizes = [8, 16], strides = [1, 1]} : vector<8x32xf32> to vector<8x16xf32>
    %cst_145 = arith.constant dense<0.000000e+00> : vector<8x8xf32>
    %242 = tpu.matmul %239, %240, %cst_145 {dimension_numbers = #tpu.dot_dimension_numbers<[1], [1], [0], [0], [0, 0, 1, 0], [], []>} : vector<8x16xf32>, vector<8x16xf32>, vector<8x8xf32> -> vector<8x8xf32>
    %243 = arith.addf %242, %5 : vector<8x8xf32>
    %cst_146 = arith.constant dense<0xFF800000> : vector<8xf32>
    %244 = vector.multi_reduction <maximumf>, %243, %cst_146 [1] : vector<8x8xf32> to vector<8xf32>
    %245 = vector.shape_cast %244 : vector<8xf32> to vector<8x1xf32>
    %246 = vector.broadcast %245 : vector<8x1xf32> to vector<8x8xf32>
    %247 = arith.subf %243, %246 : vector<8x8xf32>
    %248 = math.exp %247 : vector<8x8xf32>
    %cst_147 = arith.constant dense<0.000000e+00> : vector<8xf32>
    %249 = vector.multi_reduction <add>, %248, %cst_147 [1] : vector<8x8xf32> to vector<8xf32>
    %250 = vector.shape_cast %249 : vector<8xf32> to vector<8x1xf32>
    %251 = vector.broadcast %250 : vector<8x1xf32> to vector<8x8xf32>
    %252 = arith.divf %248, %251 : vector<8x8xf32>
    %cst_148 = arith.constant dense<0.000000e+00> : vector<8x16xf32>
    %253 = tpu.matmul %252, %241, %cst_148 {dimension_numbers = #tpu.dot_dimension_numbers<[1], [0], [0], [1], [0, 0, 1, 1], [], []>} : vector<8x8xf32>, vector<8x16xf32>, vector<8x16xf32> -> vector<8x16xf32>
    %254 = vector.extract_strided_slice %210 {offsets = [16, 0], sizes = [16, 32], strides = [1, 1]} : vector<32x32xf32> to vector<16x32xf32>
    %cst_149 = arith.constant dense<0.000000e+00> : vector<8x32xf32>
    %255 = tpu.matmul %253, %254, %cst_149 {dimension_numbers = #tpu.dot_dimension_numbers<[1], [0], [0], [1], [0, 0, 1, 1], [], []>} : vector<8x16xf32>, vector<16x32xf32>, vector<8x32xf32> -> vector<8x32xf32>
    %256 = arith.addf %238, %255 : vector<8x32xf32>
    %257 = vector.broadcast %212 : vector<1x32xf32> to vector<8x32xf32>
    %258 = arith.addf %256, %257 : vector<8x32xf32>
    %259 = arith.addf %258, %202 : vector<8x32xf32>
    %cst_150 = arith.constant dense<0.000000e+00> : vector<8xf32>
    %260 = vector.multi_reduction <add>, %259, %cst_150 [1] : vector<8x32xf32> to vector<8xf32>
    %261 = vector.shape_cast %260 : vector<8xf32> to vector<8x1xf32>
    %cst_151 = arith.constant 3.200000e+01 : f32
    %262 = vector.broadcast %cst_151 : f32 to vector<8x1xf32>
    %263 = arith.divf %261, %262 : vector<8x1xf32>
    %264 = vector.broadcast %263 : vector<8x1xf32> to vector<8x32xf32>
    %265 = arith.subf %259, %264 : vector<8x32xf32>
    %266 = arith.mulf %265, %265 : vector<8x32xf32>
    %cst_152 = arith.constant dense<0.000000e+00> : vector<8xf32>
    %267 = vector.multi_reduction <add>, %266, %cst_152 [1] : vector<8x32xf32> to vector<8xf32>
    %268 = vector.shape_cast %267 : vector<8xf32> to vector<8x1xf32>
    %cst_153 = arith.constant 3.200000e+01 : f32
    %269 = vector.broadcast %cst_153 : f32 to vector<8x1xf32>
    %270 = arith.divf %268, %269 : vector<8x1xf32>
    %cst_154 = arith.constant 9.99999974E-6 : f32
    %271 = vector.broadcast %cst_154 : f32 to vector<8x1xf32>
    %272 = arith.addf %270, %271 : vector<8x1xf32>
    %273 = math.rsqrt %272 : vector<8x1xf32>
    %274 = vector.broadcast %273 : vector<8x1xf32> to vector<8x32xf32>
    %275 = arith.mulf %265, %274 : vector<8x32xf32>
    %276 = vector.broadcast %214 : vector<1x32xf32> to vector<8x32xf32>
    %277 = arith.mulf %275, %276 : vector<8x32xf32>
    %278 = vector.broadcast %216 : vector<1x32xf32> to vector<8x32xf32>
    %279 = arith.addf %277, %278 : vector<8x32xf32>
    %c1_155 = arith.constant 1 : index
    %c0_156 = arith.constant 0 : index
    %c0_157 = arith.constant 0 : index
    %280 = vector.load %arg12[%c1_155, %c0_156, %c0_157] : memref<2x32x32xf32, #tpu.memory_space<vmem>>, vector<1x32x32xf32>
    %281 = vector.shape_cast %280 : vector<1x32x32xf32> to vector<32x32xf32>
    %c1_158 = arith.constant 1 : index
    %c0_159 = arith.constant 0 : index
    %c0_160 = arith.constant 0 : index
    %282 = vector.load %arg13[%c1_158, %c0_159, %c0_160] : memref<2x32x32xf32, #tpu.memory_space<vmem>>, vector<1x32x32xf32>
    %283 = vector.shape_cast %282 : vector<1x32x32xf32> to vector<32x32xf32>
    %c1_161 = arith.constant 1 : index
    %c0_162 = arith.constant 0 : index
    %c0_163 = arith.constant 0 : index
    %284 = vector.load %arg14[%c1_161, %c0_162, %c0_163] : memref<2x32x32xf32, #tpu.memory_space<vmem>>, vector<1x32x32xf32>
    %285 = vector.shape_cast %284 : vector<1x32x32xf32> to vector<32x32xf32>
    %c1_164 = arith.constant 1 : index
    %c0_165 = arith.constant 0 : index
    %c0_166 = arith.constant 0 : index
    %286 = vector.load %arg15[%c1_164, %c0_165, %c0_166] : memref<2x32x32xf32, #tpu.memory_space<vmem>>, vector<1x32x32xf32>
    %287 = vector.shape_cast %286 : vector<1x32x32xf32> to vector<32x32xf32>
    %c1_167 = arith.constant 1 : index
    %c0_168 = arith.constant 0 : index
    %c0_169 = arith.constant 0 : index
    %288 = vector.load %arg16[%c1_167, %c0_168, %c0_169] : memref<2x1x32xf32, #tpu.memory_space<vmem>>, vector<1x1x32xf32>
    %289 = vector.shape_cast %288 : vector<1x1x32xf32> to vector<1x32xf32>
    %c1_170 = arith.constant 1 : index
    %c0_171 = arith.constant 0 : index
    %c0_172 = arith.constant 0 : index
    %290 = vector.load %arg17[%c1_170, %c0_171, %c0_172] : memref<2x1x32xf32, #tpu.memory_space<vmem>>, vector<1x1x32xf32>
    %291 = vector.shape_cast %290 : vector<1x1x32xf32> to vector<1x32xf32>
    %c1_173 = arith.constant 1 : index
    %c0_174 = arith.constant 0 : index
    %c0_175 = arith.constant 0 : index
    %292 = vector.load %arg18[%c1_173, %c0_174, %c0_175] : memref<2x1x32xf32, #tpu.memory_space<vmem>>, vector<1x1x32xf32>
    %293 = vector.shape_cast %292 : vector<1x1x32xf32> to vector<1x32xf32>
    %cst_176 = arith.constant dense<0.000000e+00> : vector<8x32xf32>
    %294 = tpu.matmul %279, %281, %cst_176 {dimension_numbers = #tpu.dot_dimension_numbers<[1], [0], [0], [1], [0, 0, 1, 1], [], []>} : vector<8x32xf32>, vector<32x32xf32>, vector<8x32xf32> -> vector<8x32xf32>
    %cst_177 = arith.constant 0.176776692 : f32
    %295 = vector.broadcast %cst_177 : f32 to vector<8x32xf32>
    %296 = arith.mulf %294, %295 : vector<8x32xf32>
    %cst_178 = arith.constant dense<0.000000e+00> : vector<8x32xf32>
    %297 = tpu.matmul %3, %283, %cst_178 {dimension_numbers = #tpu.dot_dimension_numbers<[1], [0], [0], [1], [0, 0, 1, 1], [], []>} : vector<8x32xf32>, vector<32x32xf32>, vector<8x32xf32> -> vector<8x32xf32>
    %cst_179 = arith.constant dense<0.000000e+00> : vector<8x32xf32>
    %298 = tpu.matmul %3, %285, %cst_179 {dimension_numbers = #tpu.dot_dimension_numbers<[1], [0], [0], [1], [0, 0, 1, 1], [], []>} : vector<8x32xf32>, vector<32x32xf32>, vector<8x32xf32> -> vector<8x32xf32>
    %299 = vector.extract_strided_slice %296 {offsets = [0, 0], sizes = [8, 16], strides = [1, 1]} : vector<8x32xf32> to vector<8x16xf32>
    %300 = vector.extract_strided_slice %297 {offsets = [0, 0], sizes = [8, 16], strides = [1, 1]} : vector<8x32xf32> to vector<8x16xf32>
    %301 = vector.extract_strided_slice %298 {offsets = [0, 0], sizes = [8, 16], strides = [1, 1]} : vector<8x32xf32> to vector<8x16xf32>
    %cst_180 = arith.constant dense<0.000000e+00> : vector<8x8xf32>
    %302 = tpu.matmul %299, %300, %cst_180 {dimension_numbers = #tpu.dot_dimension_numbers<[1], [1], [0], [0], [0, 0, 1, 0], [], []>} : vector<8x16xf32>, vector<8x16xf32>, vector<8x8xf32> -> vector<8x8xf32>
    %303 = arith.addf %302, %7 : vector<8x8xf32>
    %cst_181 = arith.constant dense<0xFF800000> : vector<8xf32>
    %304 = vector.multi_reduction <maximumf>, %303, %cst_181 [1] : vector<8x8xf32> to vector<8xf32>
    %305 = vector.shape_cast %304 : vector<8xf32> to vector<8x1xf32>
    %306 = vector.broadcast %305 : vector<8x1xf32> to vector<8x8xf32>
    %307 = arith.subf %303, %306 : vector<8x8xf32>
    %308 = math.exp %307 : vector<8x8xf32>
    %cst_182 = arith.constant dense<0.000000e+00> : vector<8xf32>
    %309 = vector.multi_reduction <add>, %308, %cst_182 [1] : vector<8x8xf32> to vector<8xf32>
    %310 = vector.shape_cast %309 : vector<8xf32> to vector<8x1xf32>
    %311 = vector.broadcast %310 : vector<8x1xf32> to vector<8x8xf32>
    %312 = arith.divf %308, %311 : vector<8x8xf32>
    %cst_183 = arith.constant dense<0.000000e+00> : vector<8x16xf32>
    %313 = tpu.matmul %312, %301, %cst_183 {dimension_numbers = #tpu.dot_dimension_numbers<[1], [0], [0], [1], [0, 0, 1, 1], [], []>} : vector<8x8xf32>, vector<8x16xf32>, vector<8x16xf32> -> vector<8x16xf32>
    %314 = vector.extract_strided_slice %287 {offsets = [0, 0], sizes = [16, 32], strides = [1, 1]} : vector<32x32xf32> to vector<16x32xf32>
    %cst_184 = arith.constant dense<0.000000e+00> : vector<8x32xf32>
    %315 = tpu.matmul %313, %314, %cst_184 {dimension_numbers = #tpu.dot_dimension_numbers<[1], [0], [0], [1], [0, 0, 1, 1], [], []>} : vector<8x16xf32>, vector<16x32xf32>, vector<8x32xf32> -> vector<8x32xf32>
    %316 = vector.extract_strided_slice %296 {offsets = [0, 16], sizes = [8, 16], strides = [1, 1]} : vector<8x32xf32> to vector<8x16xf32>
    %317 = vector.extract_strided_slice %297 {offsets = [0, 16], sizes = [8, 16], strides = [1, 1]} : vector<8x32xf32> to vector<8x16xf32>
    %318 = vector.extract_strided_slice %298 {offsets = [0, 16], sizes = [8, 16], strides = [1, 1]} : vector<8x32xf32> to vector<8x16xf32>
    %cst_185 = arith.constant dense<0.000000e+00> : vector<8x8xf32>
    %319 = tpu.matmul %316, %317, %cst_185 {dimension_numbers = #tpu.dot_dimension_numbers<[1], [1], [0], [0], [0, 0, 1, 0], [], []>} : vector<8x16xf32>, vector<8x16xf32>, vector<8x8xf32> -> vector<8x8xf32>
    %320 = arith.addf %319, %7 : vector<8x8xf32>
    %cst_186 = arith.constant dense<0xFF800000> : vector<8xf32>
    %321 = vector.multi_reduction <maximumf>, %320, %cst_186 [1] : vector<8x8xf32> to vector<8xf32>
    %322 = vector.shape_cast %321 : vector<8xf32> to vector<8x1xf32>
    %323 = vector.broadcast %322 : vector<8x1xf32> to vector<8x8xf32>
    %324 = arith.subf %320, %323 : vector<8x8xf32>
    %325 = math.exp %324 : vector<8x8xf32>
    %cst_187 = arith.constant dense<0.000000e+00> : vector<8xf32>
    %326 = vector.multi_reduction <add>, %325, %cst_187 [1] : vector<8x8xf32> to vector<8xf32>
    %327 = vector.shape_cast %326 : vector<8xf32> to vector<8x1xf32>
    %328 = vector.broadcast %327 : vector<8x1xf32> to vector<8x8xf32>
    %329 = arith.divf %325, %328 : vector<8x8xf32>
    %cst_188 = arith.constant dense<0.000000e+00> : vector<8x16xf32>
    %330 = tpu.matmul %329, %318, %cst_188 {dimension_numbers = #tpu.dot_dimension_numbers<[1], [0], [0], [1], [0, 0, 1, 1], [], []>} : vector<8x8xf32>, vector<8x16xf32>, vector<8x16xf32> -> vector<8x16xf32>
    %331 = vector.extract_strided_slice %287 {offsets = [16, 0], sizes = [16, 32], strides = [1, 1]} : vector<32x32xf32> to vector<16x32xf32>
    %cst_189 = arith.constant dense<0.000000e+00> : vector<8x32xf32>
    %332 = tpu.matmul %330, %331, %cst_189 {dimension_numbers = #tpu.dot_dimension_numbers<[1], [0], [0], [1], [0, 0, 1, 1], [], []>} : vector<8x16xf32>, vector<16x32xf32>, vector<8x32xf32> -> vector<8x32xf32>
    %333 = arith.addf %315, %332 : vector<8x32xf32>
    %334 = vector.broadcast %289 : vector<1x32xf32> to vector<8x32xf32>
    %335 = arith.addf %333, %334 : vector<8x32xf32>
    %336 = arith.addf %335, %279 : vector<8x32xf32>
    %cst_190 = arith.constant dense<0.000000e+00> : vector<8xf32>
    %337 = vector.multi_reduction <add>, %336, %cst_190 [1] : vector<8x32xf32> to vector<8xf32>
    %338 = vector.shape_cast %337 : vector<8xf32> to vector<8x1xf32>
    %cst_191 = arith.constant 3.200000e+01 : f32
    %339 = vector.broadcast %cst_191 : f32 to vector<8x1xf32>
    %340 = arith.divf %338, %339 : vector<8x1xf32>
    %341 = vector.broadcast %340 : vector<8x1xf32> to vector<8x32xf32>
    %342 = arith.subf %336, %341 : vector<8x32xf32>
    %343 = arith.mulf %342, %342 : vector<8x32xf32>
    %cst_192 = arith.constant dense<0.000000e+00> : vector<8xf32>
    %344 = vector.multi_reduction <add>, %343, %cst_192 [1] : vector<8x32xf32> to vector<8xf32>
    %345 = vector.shape_cast %344 : vector<8xf32> to vector<8x1xf32>
    %cst_193 = arith.constant 3.200000e+01 : f32
    %346 = vector.broadcast %cst_193 : f32 to vector<8x1xf32>
    %347 = arith.divf %345, %346 : vector<8x1xf32>
    %cst_194 = arith.constant 9.99999974E-6 : f32
    %348 = vector.broadcast %cst_194 : f32 to vector<8x1xf32>
    %349 = arith.addf %347, %348 : vector<8x1xf32>
    %350 = math.rsqrt %349 : vector<8x1xf32>
    %351 = vector.broadcast %350 : vector<8x1xf32> to vector<8x32xf32>
    %352 = arith.mulf %342, %351 : vector<8x32xf32>
    %353 = vector.broadcast %291 : vector<1x32xf32> to vector<8x32xf32>
    %354 = arith.mulf %352, %353 : vector<8x32xf32>
    %355 = vector.broadcast %293 : vector<1x32xf32> to vector<8x32xf32>
    %356 = arith.addf %354, %355 : vector<8x32xf32>
    %c1_195 = arith.constant 1 : index
    %c0_196 = arith.constant 0 : index
    %c0_197 = arith.constant 0 : index
    %357 = vector.load %arg19[%c1_195, %c0_196, %c0_197] : memref<2x32x128xf32, #tpu.memory_space<vmem>>, vector<1x32x128xf32>
    %358 = vector.shape_cast %357 : vector<1x32x128xf32> to vector<32x128xf32>
    %cst_198 = arith.constant dense<0.000000e+00> : vector<8x128xf32>
    %359 = tpu.matmul %356, %358, %cst_198 {dimension_numbers = #tpu.dot_dimension_numbers<[1], [0], [0], [1], [0, 0, 1, 1], [], []>} : vector<8x32xf32>, vector<32x128xf32>, vector<8x128xf32> -> vector<8x128xf32>
    %c1_199 = arith.constant 1 : index
    %c0_200 = arith.constant 0 : index
    %c0_201 = arith.constant 0 : index
    %360 = vector.load %arg20[%c1_199, %c0_200, %c0_201] : memref<2x1x128xf32, #tpu.memory_space<vmem>>, vector<1x1x128xf32>
    %361 = vector.shape_cast %360 : vector<1x1x128xf32> to vector<1x128xf32>
    %362 = vector.broadcast %361 : vector<1x128xf32> to vector<8x128xf32>
    %363 = arith.addf %359, %362 : vector<8x128xf32>
    %cst_202 = arith.constant 0.000000e+00 : f32
    %364 = vector.broadcast %cst_202 : f32 to vector<8x128xf32>
    %365 = arith.maximumf %363, %364 : vector<8x128xf32>
    %c1_203 = arith.constant 1 : index
    %c0_204 = arith.constant 0 : index
    %c0_205 = arith.constant 0 : index
    %366 = vector.load %arg21[%c1_203, %c0_204, %c0_205] : memref<2x128x32xf32, #tpu.memory_space<vmem>>, vector<1x128x32xf32>
    %367 = vector.shape_cast %366 : vector<1x128x32xf32> to vector<128x32xf32>
    %cst_206 = arith.constant dense<0.000000e+00> : vector<8x32xf32>
    %368 = tpu.matmul %365, %367, %cst_206 {dimension_numbers = #tpu.dot_dimension_numbers<[1], [0], [0], [1], [0, 0, 1, 1], [], []>} : vector<8x128xf32>, vector<128x32xf32>, vector<8x32xf32> -> vector<8x32xf32>
    %c1_207 = arith.constant 1 : index
    %c0_208 = arith.constant 0 : index
    %c0_209 = arith.constant 0 : index
    %369 = vector.load %arg22[%c1_207, %c0_208, %c0_209] : memref<2x1x32xf32, #tpu.memory_space<vmem>>, vector<1x1x32xf32>
    %370 = vector.shape_cast %369 : vector<1x1x32xf32> to vector<1x32xf32>
    %371 = vector.broadcast %370 : vector<1x32xf32> to vector<8x32xf32>
    %372 = arith.addf %368, %371 : vector<8x32xf32>
    %373 = arith.addf %372, %356 : vector<8x32xf32>
    %c1_210 = arith.constant 1 : index
    %c0_211 = arith.constant 0 : index
    %c0_212 = arith.constant 0 : index
    %374 = vector.load %arg23[%c1_210, %c0_211, %c0_212] : memref<2x1x32xf32, #tpu.memory_space<vmem>>, vector<1x1x32xf32>
    %375 = vector.shape_cast %374 : vector<1x1x32xf32> to vector<1x32xf32>
    %c1_213 = arith.constant 1 : index
    %c0_214 = arith.constant 0 : index
    %c0_215 = arith.constant 0 : index
    %376 = vector.load %arg24[%c1_213, %c0_214, %c0_215] : memref<2x1x32xf32, #tpu.memory_space<vmem>>, vector<1x1x32xf32>
    %377 = vector.shape_cast %376 : vector<1x1x32xf32> to vector<1x32xf32>
    %cst_216 = arith.constant dense<0.000000e+00> : vector<8xf32>
    %378 = vector.multi_reduction <add>, %373, %cst_216 [1] : vector<8x32xf32> to vector<8xf32>
    %379 = vector.shape_cast %378 : vector<8xf32> to vector<8x1xf32>
    %cst_217 = arith.constant 3.200000e+01 : f32
    %380 = vector.broadcast %cst_217 : f32 to vector<8x1xf32>
    %381 = arith.divf %379, %380 : vector<8x1xf32>
    %382 = vector.broadcast %381 : vector<8x1xf32> to vector<8x32xf32>
    %383 = arith.subf %373, %382 : vector<8x32xf32>
    %384 = arith.mulf %383, %383 : vector<8x32xf32>
    %cst_218 = arith.constant dense<0.000000e+00> : vector<8xf32>
    %385 = vector.multi_reduction <add>, %384, %cst_218 [1] : vector<8x32xf32> to vector<8xf32>
    %386 = vector.shape_cast %385 : vector<8xf32> to vector<8x1xf32>
    %cst_219 = arith.constant 3.200000e+01 : f32
    %387 = vector.broadcast %cst_219 : f32 to vector<8x1xf32>
    %388 = arith.divf %386, %387 : vector<8x1xf32>
    %cst_220 = arith.constant 9.99999974E-6 : f32
    %389 = vector.broadcast %cst_220 : f32 to vector<8x1xf32>
    %390 = arith.addf %388, %389 : vector<8x1xf32>
    %391 = math.rsqrt %390 : vector<8x1xf32>
    %392 = vector.broadcast %391 : vector<8x1xf32> to vector<8x32xf32>
    %393 = arith.mulf %383, %392 : vector<8x32xf32>
    %394 = vector.broadcast %375 : vector<1x32xf32> to vector<8x32xf32>
    %395 = arith.mulf %393, %394 : vector<8x32xf32>
    %396 = vector.broadcast %377 : vector<1x32xf32> to vector<8x32xf32>
    %397 = arith.addf %395, %396 : vector<8x32xf32>
    %c0_221 = arith.constant 0 : index
    %c0_222 = arith.constant 0 : index
    %398 = vector.load %arg25[%c0_221, %c0_222] : memref<32x128xf32, #tpu.memory_space<vmem>>, vector<32x128xf32>
    %cst_223 = arith.constant dense<0.000000e+00> : vector<8x128xf32>
    %399 = tpu.matmul %397, %398, %cst_223 {dimension_numbers = #tpu.dot_dimension_numbers<[1], [0], [0], [1], [0, 0, 1, 1], [], []>} : vector<8x32xf32>, vector<32x128xf32>, vector<8x128xf32> -> vector<8x128xf32>
    %c0_224 = arith.constant 0 : index
    %c0_225 = arith.constant 0 : index
    %400 = vector.load %arg26[%c0_224, %c0_225] : memref<1x128xf32, #tpu.memory_space<vmem>>, vector<1x128xf32>
    %401 = vector.broadcast %400 : vector<1x128xf32> to vector<8x128xf32>
    %402 = arith.addf %399, %401 : vector<8x128xf32>
    %c0_226 = arith.constant 0 : index
    %c0_227 = arith.constant 0 : index
    %c0_228 = arith.constant 0 : index
    %403 = vector.load %arg27[%c0_226, %c0_227, %c0_228] : memref<1x8x128xf32, #tpu.memory_space<vmem>>, vector<1x8x128xf32>
    %404 = vector.shape_cast %403 : vector<1x8x128xf32> to vector<8x128xf32>
    %405 = vector.shape_cast %402 : vector<8x128xf32> to vector<1x8x128xf32>
    tpu.vector_store %arg27[%c0_226, %c0_227, %c0_228], %405 {strides = array<i32>} : memref<1x8x128xf32, #tpu.memory_space<vmem>>, vector<1x8x128xf32>,
    return
  }
  func.func @transform_0(%arg0: i32) -> (i32, i32, i32) {
    %c0_i32 = arith.constant 0 : i32
    %c0_i32_0 = arith.constant 0 : i32
    %c0_i32_1 = arith.constant 0 : i32
    return %arg0, %c0_i32, %c0_i32_0 : i32, i32, i32
  }
  func.func @transform_1(%arg0: i32) -> (i32, i32, i32) {
    %c0_i32 = arith.constant 0 : i32
    %c0_i32_0 = arith.constant 0 : i32
    %c0_i32_1 = arith.constant 0 : i32
    return %arg0, %c0_i32, %c0_i32_0 : i32, i32, i32
  }
  func.func @transform_2(%arg0: i32) -> (i32, i32, i32) {
    %c0_i32 = arith.constant 0 : i32
    %c0_i32_0 = arith.constant 0 : i32
    %c0_i32_1 = arith.constant 0 : i32
    %c0_i32_2 = arith.constant 0 : i32
    return %c0_i32, %c0_i32_0, %c0_i32_1 : i32, i32, i32
  }
  func.func @transform_3(%arg0: i32) -> (i32, i32, i32) {
    %c0_i32 = arith.constant 0 : i32
    %c0_i32_0 = arith.constant 0 : i32
    %c0_i32_1 = arith.constant 0 : i32
    return %arg0, %c0_i32, %c0_i32_0 : i32, i32, i32
  }
  func.func @transform_4(%arg0: i32) -> (i32, i32, i32) {
    %c0_i32 = arith.constant 0 : i32
    %c0_i32_0 = arith.constant 0 : i32
    %c0_i32_1 = arith.constant 0 : i32
    %c0_i32_2 = arith.constant 0 : i32
    return %c0_i32, %c0_i32_0, %c0_i32_1 : i32, i32, i32
  }
  func.func @transform_5(%arg0: i32) -> (i32, i32, i32) {
    %c0_i32 = arith.constant 0 : i32
    %c0_i32_0 = arith.constant 0 : i32
    %c0_i32_1 = arith.constant 0 : i32
    %c0_i32_2 = arith.constant 0 : i32
    return %c0_i32, %c0_i32_0, %c0_i32_1 : i32, i32, i32
  }
  func.func @transform_6(%arg0: i32) -> (i32, i32, i32) {
    %c0_i32 = arith.constant 0 : i32
    %c0_i32_0 = arith.constant 0 : i32
    %c0_i32_1 = arith.constant 0 : i32
    %c0_i32_2 = arith.constant 0 : i32
    return %c0_i32, %c0_i32_0, %c0_i32_1 : i32, i32, i32
  }
  func.func @transform_7(%arg0: i32) -> (i32, i32, i32) {
    %c0_i32 = arith.constant 0 : i32
    %c0_i32_0 = arith.constant 0 : i32
    %c0_i32_1 = arith.constant 0 : i32
    %c0_i32_2 = arith.constant 0 : i32
    return %c0_i32, %c0_i32_0, %c0_i32_1 : i32, i32, i32
  }
  func.func @transform_8(%arg0: i32) -> (i32, i32, i32) {
    %c0_i32 = arith.constant 0 : i32
    %c0_i32_0 = arith.constant 0 : i32
    %c0_i32_1 = arith.constant 0 : i32
    %c0_i32_2 = arith.constant 0 : i32
    return %c0_i32, %c0_i32_0, %c0_i32_1 : i32, i32, i32
  }
  func.func @transform_9(%arg0: i32) -> (i32, i32, i32) {
    %c0_i32 = arith.constant 0 : i32
    %c0_i32_0 = arith.constant 0 : i32
    %c0_i32_1 = arith.constant 0 : i32
    %c0_i32_2 = arith.constant 0 : i32
    return %c0_i32, %c0_i32_0, %c0_i32_1 : i32, i32, i32
  }
  func.func @transform_10(%arg0: i32) -> (i32, i32, i32) {
    %c0_i32 = arith.constant 0 : i32
    %c0_i32_0 = arith.constant 0 : i32
    %c0_i32_1 = arith.constant 0 : i32
    %c0_i32_2 = arith.constant 0 : i32
    return %c0_i32, %c0_i32_0, %c0_i32_1 : i32, i32, i32
  }
  func.func @transform_11(%arg0: i32) -> (i32, i32, i32) {
    %c0_i32 = arith.constant 0 : i32
    %c0_i32_0 = arith.constant 0 : i32
    %c0_i32_1 = arith.constant 0 : i32
    %c0_i32_2 = arith.constant 0 : i32
    return %c0_i32, %c0_i32_0, %c0_i32_1 : i32, i32, i32
  }
  func.func @transform_12(%arg0: i32) -> (i32, i32, i32) {
    %c0_i32 = arith.constant 0 : i32
    %c0_i32_0 = arith.constant 0 : i32
    %c0_i32_1 = arith.constant 0 : i32
    %c0_i32_2 = arith.constant 0 : i32
    return %c0_i32, %c0_i32_0, %c0_i32_1 : i32, i32, i32
  }
  func.func @transform_13(%arg0: i32) -> (i32, i32, i32) {
    %c0_i32 = arith.constant 0 : i32
    %c0_i32_0 = arith.constant 0 : i32
    %c0_i32_1 = arith.constant 0 : i32
    %c0_i32_2 = arith.constant 0 : i32
    return %c0_i32, %c0_i32_0, %c0_i32_1 : i32, i32, i32
  }
  func.func @transform_14(%arg0: i32) -> (i32, i32, i32) {
    %c0_i32 = arith.constant 0 : i32
    %c0_i32_0 = arith.constant 0 : i32
    %c0_i32_1 = arith.constant 0 : i32
    %c0_i32_2 = arith.constant 0 : i32
    return %c0_i32, %c0_i32_0, %c0_i32_1 : i32, i32, i32
  }
  func.func @transform_15(%arg0: i32) -> (i32, i32, i32) {
    %c0_i32 = arith.constant 0 : i32
    %c0_i32_0 = arith.constant 0 : i32
    %c0_i32_1 = arith.constant 0 : i32
    %c0_i32_2 = arith.constant 0 : i32
    return %c0_i32, %c0_i32_0, %c0_i32_1 : i32, i32, i32
  }
  func.func @transform_16(%arg0: i32) -> (i32, i32, i32) {
    %c0_i32 = arith.constant 0 : i32
    %c0_i32_0 = arith.constant 0 : i32
    %c0_i32_1 = arith.constant 0 : i32
    %c0_i32_2 = arith.constant 0 : i32
    return %c0_i32, %c0_i32_0, %c0_i32_1 : i32, i32, i32
  }
  func.func @transform_17(%arg0: i32) -> (i32, i32, i32) {
    %c0_i32 = arith.constant 0 : i32
    %c0_i32_0 = arith.constant 0 : i32
    %c0_i32_1 = arith.constant 0 : i32
    %c0_i32_2 = arith.constant 0 : i32
    return %c0_i32, %c0_i32_0, %c0_i32_1 : i32, i32, i32
  }
  func.func @transform_18(%arg0: i32) -> (i32, i32, i32) {
    %c0_i32 = arith.constant 0 : i32
    %c0_i32_0 = arith.constant 0 : i32
    %c0_i32_1 = arith.constant 0 : i32
    %c0_i32_2 = arith.constant 0 : i32
    return %c0_i32, %c0_i32_0, %c0_i32_1 : i32, i32, i32
  }
  func.func @transform_19(%arg0: i32) -> (i32, i32, i32) {
    %c0_i32 = arith.constant 0 : i32
    %c0_i32_0 = arith.constant 0 : i32
    %c0_i32_1 = arith.constant 0 : i32
    %c0_i32_2 = arith.constant 0 : i32
    return %c0_i32, %c0_i32_0, %c0_i32_1 : i32, i32, i32
  }
  func.func @transform_20(%arg0: i32) -> (i32, i32, i32) {
    %c0_i32 = arith.constant 0 : i32
    %c0_i32_0 = arith.constant 0 : i32
    %c0_i32_1 = arith.constant 0 : i32
    %c0_i32_2 = arith.constant 0 : i32
    return %c0_i32, %c0_i32_0, %c0_i32_1 : i32, i32, i32
  }
  func.func @transform_21(%arg0: i32) -> (i32, i32, i32) {
    %c0_i32 = arith.constant 0 : i32
    %c0_i32_0 = arith.constant 0 : i32
    %c0_i32_1 = arith.constant 0 : i32
    %c0_i32_2 = arith.constant 0 : i32
    return %c0_i32, %c0_i32_0, %c0_i32_1 : i32, i32, i32
  }
  func.func @transform_22(%arg0: i32) -> (i32, i32, i32) {
    %c0_i32 = arith.constant 0 : i32
    %c0_i32_0 = arith.constant 0 : i32
    %c0_i32_1 = arith.constant 0 : i32
    %c0_i32_2 = arith.constant 0 : i32
    return %c0_i32, %c0_i32_0, %c0_i32_1 : i32, i32, i32
  }
  func.func @transform_23(%arg0: i32) -> (i32, i32, i32) {
    %c0_i32 = arith.constant 0 : i32
    %c0_i32_0 = arith.constant 0 : i32
    %c0_i32_1 = arith.constant 0 : i32
    %c0_i32_2 = arith.constant 0 : i32
    return %c0_i32, %c0_i32_0, %c0_i32_1 : i32, i32, i32
  }
  func.func @transform_24(%arg0: i32) -> (i32, i32) {
    %c0_i32 = arith.constant 0 : i32
    %c0_i32_0 = arith.constant 0 : i32
    %c0_i32_1 = arith.constant 0 : i32
    return %c0_i32, %c0_i32_0 : i32, i32
  }
  func.func @transform_25(%arg0: i32) -> (i32, i32) {
    %c0_i32 = arith.constant 0 : i32
    %c0_i32_0 = arith.constant 0 : i32
    %c0_i32_1 = arith.constant 0 : i32
    return %c0_i32, %c0_i32_0 : i32, i32
  }
  func.func @transform_26(%arg0: i32) -> (i32, i32, i32) {
    %c0_i32 = arith.constant 0 : i32
    %c0_i32_0 = arith.constant 0 : i32
    %c0_i32_1 = arith.constant 0 : i32
    return %arg0, %c0_i32, %c0_i32_0 : i32, i32, i32
  }
}

</mosaic_0001>

<bundles_post_ra>
// kernel: decoder_forward.1
= control target key start
LH: loop header
LB: loop body
LE: loop exit
PB: predicated region body
PF: predicated region fallthrough
CT: control target
= control target key end

     0   :  { %s6200_s0 = inlined_call_operand.vmem [shape: f32[2,8,32], index: 0, kind: input, shape index: {}]   ;;  %s6201_s1 = inlined_call_operand.vmem [shape: f32[2,8,32], index: 1, kind: input, shape index: {}]   ;;  %s6202_s2 = inlined_call_operand.vmem [shape: f32[1,8,8], index: 2, kind: input, shape index: {}]   ;;  %s6203_s3 = inlined_call_operand.vmem [shape: f32[2,8,8], index: 3, kind: input, shape index: {}]   ;;  %s6204_s4 = inlined_call_operand.vmem [shape: f32[2,32,32], index: 4, kind: input, shape index: {}]   ;;  %s6205_s5 = inlined_call_operand.vmem [shape: f32[2,32,32], index: 5, kind: input, shape index: {}]   ;;  %s6206_s6 = inlined_call_operand.vmem [shape: f32[2,32,32], index: 6, kind: input, shape index: {}]   ;;  %s6207_s7 = inlined_call_operand.vmem [shape: f32[2,32,32], index: 7, kind: input, shape index: {}]   ;;  %s6208_s8 = inlined_call_operand.vmem [shape: f32[2,1,32], index: 8, kind: input, shape index: {}]   ;;  %s6209_s9 = inlined_call_operand.vmem [shape: f32[2,1,32], index: 9, kind: input, shape index: {}]   ;;  %s6210_s10 = inlined_call_operand.vmem [shape: f32[2,1,32], index: 10, kind: input, shape index: {}]   ;;  %s6211_s11 = inlined_call_operand.vmem [shape: f32[2,32,32], index: 11, kind: input, shape index: {}]   ;;  %s6212_s12 = inlined_call_operand.vmem [shape: f32[2,32,32], index: 12, kind: input, shape index: {}]   ;;  %s6213_s13 = inlined_call_operand.vmem [shape: f32[2,32,32], index: 13, kind: input, shape index: {}]   ;;  %s6214_s14 = inlined_call_operand.vmem [shape: f32[2,32,32], index: 14, kind: input, shape index: {}]   ;;  %s6215_s15 = inlined_call_operand.vmem [shape: f32[2,1,32], index: 15, kind: input, shape index: {}]   ;;  %s6216_s16 = inlined_call_operand.vmem [shape: f32[2,1,32], index: 16, kind: input, shape index: {}]   ;;  %s6217_s17 = inlined_call_operand.vmem [shape: f32[2,1,32], index: 17, kind: input, shape index: {}]   ;;  %s6218_s18 = inlined_call_operand.vmem [shape: f32[2,32,128], index: 18, kind: input, shape index: {}]   ;;  %s6219_s19 = inlined_call_operand.vmem [shape: f32[2,1,128], index: 19, kind: input, shape index: {}]   ;;  %s6220_s20 = inlined_call_operand.vmem [shape: f32[2,128,32], index: 20, kind: input, shape index: {}]   ;;  %s6221_s21 = inlined_call_operand.vmem [shape: f32[2,1,32], index: 21, kind: input, shape index: {}]   ;;  %s6222_s22 = inlined_call_operand.vmem [shape: f32[2,1,32], index: 22, kind: input, shape index: {}]   ;;  %s6223_s23 = inlined_call_operand.vmem [shape: f32[2,1,32], index: 23, kind: input, shape index: {}]   ;;  %s6224_s24 = inlined_call_operand.vmem [shape: f32[32,128], index: 24, kind: input, shape index: {}]   ;;  %s6225_s25 = inlined_call_operand.vmem [shape: f32[1,128], index: 25, kind: input, shape index: {}]   ;;  %s6226_s26 = inlined_call_operand.hbm [shape: f32[2,8,128], index: 26, kind: output, shape index: {}]  }
   0x1   :  { %6251 = sst [smem:[#allocation14_spill]] %s6200_s0 }
   0x2   :  { %6252 = sst [smem:[#allocation15_spill]] %s6201_s1 }
   0x3   :  { %6253 = sst [smem:[#allocation16_spill]] %s6202_s2 }
   0x4   :  { %6254 = sst [smem:[#allocation17_spill]] %s6203_s3 }
   0x5   :  { %6255 = sst [smem:[#allocation18_spill]] %s6204_s4 }
   0x6   :  { %6256 = sst [smem:[#allocation19_spill]] %s6205_s5 }
   0x7   :  { %6257 = sst [smem:[#allocation20_spill]] %s6206_s6 }
   0x8   :  { %6258 = sst [smem:[#allocation21_spill]] %s6207_s7 }
   0x9   :  { %6259 = sst [smem:[#allocation22_spill]] %s6208_s8 }
   0xa   :  { %6260 = sst [smem:[#allocation23_spill]] %s6209_s9 }
   0xb   :  { %6261 = sst [smem:[#allocation24_spill]] %s6210_s10 }
   0xc   :  { %6262 = sst [smem:[#allocation25_spill]] %s6211_s11 }
   0xd   :  { %6263 = sst [smem:[#allocation26_spill]] %s6212_s12 }
   0xe   :  { %6264 = sst [smem:[#allocation27_spill]] %s6213_s13 }
   0xf   :  { %6265 = sst [smem:[#allocation28_spill]] %s6225_s25 }
  0x10   :  { %6266 = sst [smem:[#allocation29_spill]] %s6226_s26 }
  0x11   :  { %31 = vsyncpa [#allocation3], 0 }
  0x12   :  { %33 = vsyncpa [#allocation3 + $0x1], 0  ;;  %s5375_s27 = smov 0   ;;  %s5377_s3 = smov 0  }
  0x13   :  { %s5379_s7 = smov 0   ;;  %s5381_s28 = smov 0  }
  0x14 LB: > { %6267 = sst [smem:[#allocation5_spill]] %s5222_s27  ;;  %s5396_s8 = sadd.s32 4294967295, %s5234_s28   ;;  %s5234_s28 = sphi %s5381_s28, %s6303_s28   ;;  %s5230_s7 = sphi %s5379_s7, %s6306_s7   ;;  %s5226_s3 = sphi %s5377_s3, %s6305_s3   ;;  %s5222_s27 = sphi %s5375_s27, %s6304_s27  }
  0x15   : > { %6268 = sst [smem:[#allocation6_spill]] %s5226_s3  ;;  %s4410_s4 = sadd.s32 4294967294, %s5234_s28  }
  0x16   : > { %6269 = sst [smem:[#allocation7_spill]] %s5230_s7  ;;  %s5400_s29 = sadd.s32 1, %s5234_s28  }
  0x17   : > { %6270 = sst [smem:[#allocation8_spill]] %s5234_s28  ;;  %s607_s0 = sadd.s32 1, %s5230_s7 }
  0x18   : > { %6271 = sst [smem:[#allocation9_spill]] %s5396_s8  ;;  %s604_s9 = ssub.s32 %s5234_s28, %s5400_s29 }
  0x19   : > { %6272 = sst [smem:[#allocation10_spill]] %s5400_s29  ;;  %p617_p0 = scmp.ne.s32.totalorder %s5230_s7, %s5226_s3 }
  0x1a   : > { %p605_p1 = scmp.eq.s32.totalorder %s604_s9, 0  ;;  %p618_p2 = scmp.eq.s32.totalorder %s5396_s8, 1 }
  0x1b   : > { %p623_p3 = scmp.ne.s32.totalorder %s5226_s3, %s5222_s27  ;;  %p624_p4 = scmp.eq.s32.totalorder %s4410_s4, 1 }
  0x1c   : > { %s5411_s30 = scalar_select %p605_p1, %s5230_s7, %s607_s0  }
  0x1d   : > { %p5413_p5 = por %p618_p2, %p617_p0  ;;  %p5417_p6 = por %p624_p4, %p623_p3 }
  0x1e   : > { %6273 = sst [smem:[#allocation11_spill]] %s5411_s30  ;;  %p4413_p7 = scmp.ge.s32.totalorder %s5234_s28, 1 }
  0x1f   : > { %s6274_s2 = scalar_select %p5413_p5, 1, 0 }
  0x20   : > { %s6276_s5 = scalar_select %p5417_p6, 1, 0 }
  0x21   : > { %6275 = sst [smem:[#allocation12_spill]] %s6274_s2  ;;  %p732_p8 = scmp.lt.s32.totalorder %s5234_s28, 3 }
  0x22   : > { %6277 = sst [smem:[#allocation13_spill]] %s6276_s5 }
  0x23   : > { %p733_p9 = pnand %p4413_p7, %p732_p8 }
  0x24   : > { %s6278_s1 = sld [smem:[#allocation18_spill]] (!%p733_p9)  ;;  %p809_p10 = scmp.lt.s32.totalorder (!%p733_p9), %s5396_s8, 1 }
  0x25   : > { %736 = sbr.rel (%p733_p9) target bundleno = 7750 (0x1e46), region = 124  ;;  %s6279_s5 = sld [smem:[#allocation14_spill]] (!%p733_p9) }
  0x26   : > { %s6280_s6 = sld [smem:[#allocation19_spill]] (!%p733_p9)  ;;  %s6240_s10 = smov (!%p733_p9), 112  }
  0x27   : > { %s6281_s30 = sld [smem:[#allocation20_spill]] (!%p733_p9)  ;;  %s6291_s26 = smov (!%p733_p9), 112  }
  0x28   : > { %s6282_s0 = sld [smem:[#allocation16_spill]] (!%p733_p9) }
  0x29   : > { %s6283_s29 = sld [smem:[#allocation21_spill]] (!%p733_p9) }
  0x2a   : > { %v828_v0 = vld [vmem:[%s6278_s1 + $0x18] sm:$0xff]  ;;  %v5236_v1 = vmov 0.0   ;;  %v827_v2 = vld [vmem:[%s6278_s1 + $0x10] sm:$0xff]  ;;  %vm5237_vm0 = vmmov 0   ;;  %s810_s9 = scalar_select %p809_p10, %s5396_s8, 1  ;;  %v826_v3 = vld [vmem:[%s6278_s1 + $0x8] sm:$0xff] }
  0x2b   : > { %4717 = vmatprep.subr.mxu0 %v5236_v1  ;;  %4725 = vmatprep.mubr.msk.f32.mxu0 %vm5237_vm0, %v5236_v1  ;;  %v825_v4 = vld [vmem:[%s6278_s1] sm:$0xff]  ;;  %vm844_vm1 = vcmask 261120   ;;  %vm1059_vm2 = vcmask 130048   ;;  %vm1136_vm3 = vcmask 64512   ;;  %s6285_s12 = sld [smem:[#allocation26_spill]] }
  0x2c   : > { %4718 = vmatpush3.msra.mxu0 %v828_v0  ;;  %4750 = vmatprep.subr.mxu1 %v5236_v1  ;;  %s5441_s4 = sshll.u32 %s810_s9, 3  ;;  %v832_v6 = vld [vmem:[%s6280_s6 + $0x18] sm:$0xff]  ;;  %v831_v7 = vld [vmem:[%s6280_s6 + $0x10] sm:$0xff]  ;;  %v830_v8 = vld [vmem:[%s6280_s6 + $0x8] sm:$0xff]  ;;  %s6284_s9 = sld [smem:[#allocation22_spill]] }
  0x2d   : > { %4719 = vmatprep.subr.mxu0 %v5236_v1  ;;  %4752 = vmatprep.mubr.msk.f32.mxu1 %vm5237_vm0, %v5236_v1  ;;  %s812_s27 = scalar_lea.vmem %s6279_s5, %s5441_s4  ;;  %v829_v9 = vld [vmem:[%s6280_s6] sm:$0xff]  ;;  %v836_v10 = vld [vmem:[%s6281_s30 + $0x18] sm:$0xff]  ;;  %v835_v11 = vld [vmem:[%s6281_s30 + $0x10] sm:$0xff]  ;;  %s6286_s11 = sld [smem:[#allocation25_spill]] }
  0x2e   : > { %4720 = vmatpush3.msra.mxu0 %v827_v2  ;;  %v5451_v5 = vld [vmem:[%s812_s27] sm:$0xff]  ;;  %v834_v12 = vld [vmem:[%s6281_s30 + $0x8] sm:$0xff]  ;;  %s6287_s2 = sld [smem:[#allocation15_spill]] }
  0x2f   : > { %4721 = vmatprep.subr.mxu0 %v5236_v1  ;;  %v833_v13 = vld [vmem:[%s6281_s30] sm:$0xff]  ;;  %v840_v45 = vld [vmem:[%s6283_s29 + $0x18] sm:$0xff]  ;;  %v838_v50 = vld [vmem:[%s6283_s29 + $0x8] sm:$0xff]  ;;  %s6288_s7 = sld [smem:[#allocation23_spill]] }
  0x30   : > { %4722 = vmatpush3.msra.mxu0 %v826_v3  ;;  %v5515_v23 = vld [vmem:[%s6282_s0] sm:$0xff]  ;;  %v839_v52 = vld [vmem:[%s6283_s29 + $0x10] sm:$0xff]  ;;  %s6290_s25 = sld [smem:[#allocation24_spill]] }
  0x31   : > { %4723 = vmatprep.subr.mxu0 %v5236_v1  ;;  %v837_v51 = vld [vmem:[%s6283_s29] sm:$0xff]  ;;  %s6292_s13 = sld [smem:[#allocation27_spill]] }
  0x32   : > { %4724 = vmatpush3.msra.mxu0 %v825_v4  ;;  %v4429_v59 = vld [vmem:[%s6284_s9] ss:$0 sm:$0xff]  ;;  %s6293_s27 = sld [smem:[#allocation17_spill]] }
  0x33   : > { %4726 = vmatmul.mubr.msk.f32.vlgmr.msra.gmra.mxu0 %vm844_vm1, %v5451_v5  ;;  %4728 = vmatprep.subr.mxu0 %v5236_v1  ;;  %s6295_s28 = sld [smem:[#allocation9_spill]] }
  0x34   : > { %4729 = vmatpush3.msra.mxu0 %v832_v6  ;;  %4736 = vmatprep.mubr.msk.f32.mxu0 %vm5237_vm0, %v5236_v1  ;;  %s816_s8 = scalar_lea.vmem %s6287_s2, %s5441_s4 }
  0x35   : > { %4730 = vmatprep.subr.mxu0 %v5236_v1  ;;  %s6289_s5 = smov %s6288_s7 }
  0x36   : > { %4731 = vmatpush3.msra.mxu0 %v831_v7 }
  0x37   : > { %4732 = vmatprep.subr.mxu0 %v5236_v1 }
  0x38   : > { %4733 = vmatpush3.msra.mxu0 %v830_v8 }
  0x39   : > { %4734 = vmatprep.subr.mxu0 %v5236_v1 }
  0x3a   : > { %4735 = vmatpush3.msra.mxu0 %v829_v9  ;;  %v1576_v9 = vld [vmem:[%s6285_s12 + $0x18] sm:$0xff] }
  0x3b   : > { %4737 = vmatmul.mubr.msk.f32.vlgmr.msra.gmra.mxu0 %vm844_vm1, %v5451_v5  ;;  %4739 = vmatprep.subr.mxu0 %v5236_v1 }
  0x3c   : > { %4747 = vmatprep.mubr.msk.f32.mxu0 %vm5237_vm0, %v5236_v1  ;;  %4740 = vmatpush3.msra.mxu0 %v836_v10  ;;  %v1572_v10 = vld [vmem:[%s6286_s11 + $0x18] sm:$0xff] }
  0x3d   : > { %4741 = vmatprep.subr.mxu0 %v5236_v1 }
  0x3e   : > { %4742 = vmatpush3.msra.mxu0 %v835_v11  ;;  %v1574_v11 = vld [vmem:[%s6285_s12 + $0x8] sm:$0xff] }
  0x3f   : > { %4743 = vmatprep.subr.mxu0 %v5236_v1 }
  0x40   : > { %4744 = vmatpush3.msra.mxu0 %v834_v12  ;;  %v1571_v12 = vld [vmem:[%s6286_s11 + $0x10] sm:$0xff] }
  0x41   : > { %4745 = vmatprep.subr.mxu0 %v5236_v1 }
  0x42   : > { %4746 = vmatpush3.msra.mxu0 %v833_v13  ;;  %v1573_v13 = vld [vmem:[%s6285_s12] sm:$0xff] }
  0x43   : > { %4748 = vmatmul.mubr.msk.f32.vlgmr.msra.gmra.mxu0 %vm844_vm1, %v5451_v5  ;;  %4760 = vmatprep.subr.mxu0 %v5236_v1 }
  0x44   : > { %4762 = vmatprep.mubr.msk.f32.mxu0 %vm5237_vm0, %v5236_v1 }
  0xf3   : > { %v914_v14 = vpop.f32.mrf.mxu0 }
  0xf4   : > { %v918_v17 = vmul.f32 0.17677669, %v914_v14  ;;  %v1570_v14 = vld [vmem:[%s6286_s11 + $0x8] sm:$0xff] }
  0xf5   : > { %v4727_v15 = vpop.f32.mrf.mxu0 }
  0xf6   : > { %v5588_v15 = vld [vmem:[%s816_s8] sm:$0xff]  ;;  %s820_s8 = scalar_lea.vmem %s6293_s27, %s5441_s4  ;;  %s6298_s27 = sld [smem:[#allocation29_spill]] }
  0xfb   : > { %v985_v16 = vpop.f32.mrf.mxu0 }
  0xfc   : > { %1223 = vrot.lane.b32.xlu0 %v985_v16, %s6240_s10  ;;  %4751 = vmatpush3.xpose.msk.msra.mxu1 %vm1059_vm2, %v985_v16  ;;  %v1569_v16 = vld [vmem:[%s6286_s11] sm:$0xff] }
  0xfd   : > { %v4738_v18 = vpop.f32.mrf.mxu0  ;;  %4755 = vmatprep.subr.mxu1 %v5236_v1 }
  0xff   : > { %4753 = vmatmul.mubr.msk.f32.vlgmr.msra.gmra.mxu1 %vm1059_vm2, %v918_v17 }
 0x100   : > { %1221 = vrot.lane.b32.xlu0 %v918_v17, %s6240_s10  ;;  %4757 = vmatprep.mubr.msk.f32.mxu1 %vm5237_vm0, %v5236_v1 }
 0x103   : > { %v1055_v19 = vpop.f32.mrf.mxu0 }
 0x104   : > { %4756 = vmatpush3.msra.mxu1 %v1055_v19 }
 0x105   : > { %v4749_v20 = vpop.f32.mrf.mxu0  ;;  %4765 = vmatprep.subr.mxu1 %v5236_v1 }
 0x16e   : > { %v1224_v21 = vpop.permute.xlu0 %1223 }
 0x16f   : > { %4761 = vmatpush3.xpose.msk.msra.mxu0 %vm1059_vm2, %v1224_v21  ;;  %v4430_v21 = vld [vmem:[%s6288_s7] ss:$0 sm:$0xff] }
 0x170   : > { %4770 = vmatprep.subr.mxu0 %v5236_v1 }
 0x172   : > { %v1222_v22 = vpop.permute.xlu0 %1221 }
 0x173   : > { %4763 = vmatmul.mubr.msk.f32.vlgmr.msra.gmra.mxu0 %vm1059_vm2, %v1222_v22 }
 0x174   : > { %4774 = vmatprep.mubr.msk.f32.mxu0 %vm5237_vm0, %v5236_v1  ;;  %4771 = vmatpush3.msra.mxu0 %v840_v45 }
 0x175   : > { %4772 = vmatprep.subr.mxu0 %v5236_v1 }
 0x176   : > { %4773 = vmatpush3.msra.mxu0 %v839_v52 }
 0x177   : > { %4784 = vmatprep.subr.mxu0 %v5236_v1 }
 0x1bf   : > { %v1132_v24 = vpop.f32.mrf.mxu1 }
 0x1c0   : > { %v1133_v25 = vadd.f32 %v1132_v24, %v5515_v23  ;;  %v4431_v24 = vld [vmem:[%s6290_s25] ss:$0 sm:$0xff] }
 0x1c1   : > { %v4754_v26 = vpop.f32.mrf.mxu1 }
 0x1c2   : > { %v1137_v27 = vsel %vm1136_vm3, %v1133_v25, -inf }
 0x1c3   : > { %1138 = vmax.xlane.f32.xlu1 %v1137_v27 }
 0x233   : > { %v1295_v28 = vpop.f32.mrf.mxu0 }
 0x234   : > { %v1296_v29 = vadd.f32 %v1295_v28, %v5515_v23 }
 0x235   : > { %v4764_v30 = vpop.f32.mrf.mxu0 }
 0x236   : > { %v1299_v31 = vsel %vm1136_vm3, %v1296_v29, -inf  ;;  %v1579_v30 = vld [vmem:[%s6292_s13 + $0x10] sm:$0xff] }
 0x237   : > { %1300 = vmax.xlane.f32.xlu1 %v1299_v31  ;;  %v1578_v31 = vld [vmem:[%s6292_s13 + $0x8] sm:$0xff] }
 0x24c   : > { %v1139_v32 = vpop.xlane.xlu1 %1138 }
 0x24d   : > { %v1140_v33 = vsub.f32 %v1133_v25, %v1139_v32  ;;  %v1577_v32 = vld [vmem:[%s6292_s13] sm:$0xff] }
 0x24f   : > { %v1141_v34 = vmul.f32 1.442695, %v1140_v33 }
 0x251   : > { %5130 = vpow2.f32 %v1141_v34 }
 0x25e   : > { %v5131_v35 = vpop.eup %5130 }
 0x25f   : > { %v1143_v36 = vsel %vm1136_vm3, %v5131_v35, 0.0 }
 0x260   : > { %1144 = vadd.xlane.f32.xlu0 %v1143_v36 }
 0x2c0   : > { %v1301_v37 = vpop.xlane.xlu1 %1300 }
 0x2c1   : > { %v1302_v38 = vsub.f32 %v1296_v29, %v1301_v37  ;;  %v1580_v29 = vld [vmem:[%s6292_s13 + $0x18] sm:$0xff] }
 0x2c3   : > { %v1303_v39 = vmul.f32 1.442695, %v1302_v38 }
 0x2c5   : > { %5132 = vpow2.f32 %v1303_v39 }
 0x2d2   : > { %v5133_v40 = vpop.eup %5132 }
 0x2d3   : > { %v1305_v41 = vsel %vm1136_vm3, %v5133_v40, 0.0 }
 0x2d4   : > { %1306 = vadd.xlane.f32.xlu1 %v1305_v41 }
 0x2e5   : > { %1311 = vrot.lane.b32.xlu1 %v1055_v19, %s6240_s10  ;;  %s6294_s10 = sld [smem:[#allocation6_spill]] }
 0x2e9   : > { %v1145_v42 = vpop.xlane.xlu0 %1144 }
 0x2ea   : > { %5134 = vrcp.f32 %v1145_v42 }
 0x2eb   : > { %s806_s4 = sand.u32 1, %s6294_s10  }
 0x2ec   : > { %s4414_s2 = sshll.u32 %s806_s4, 3 }
 0x2f7   : > { %v5135_v43 = vpop.eup %5134 }
 0x2f8   : > { %v1147_v44 = vmul.f32 %v5135_v43, %v5131_v35 }
 0x2fa   : > { %4758 = vmatmul.mubr.msk.f32.vlgmr.msra.gmra.mxu1 %vm1136_vm3, %v1147_v44 }
 0x2fb   : > { %4767 = vmatprep.mubr.msk.f32.mxu1 %vm5237_vm0, %v5236_v1 }
 0x35d   : > { %v1307_v46 = vpop.xlane.xlu1 %1306 }
 0x35e   : > { %5136 = vrcp.f32 %v1307_v46 }
 0x361   : > { %v1312_v47 = vpop.permute.xlu1 %1311 }
 0x362   : > { %4766 = vmatpush3.msra.mxu1 %v1312_v47 }
 0x363   : > { %4777 = vmatprep.subr.mxu1 %v5236_v1 }
 0x36b   : > { %v5137_v48 = vpop.eup %5136 }
 0x36c   : > { %v1309_v49 = vmul.f32 %v5137_v48, %v5133_v40  ;;  %v5650_v40 = vld [vmem:[%s820_s8] sm:$0xff]  ;;  %s6299_s8 = smov %s6298_s27 }
 0x36e   : > { %4768 = vmatmul.mubr.msk.f32.vlgmr.msra.gmra.mxu1 %vm1136_vm3, %v1309_v49 }
 0x36f   : > { %4778 = vmatpush3.msra.mxu1 %v838_v50  ;;  %4781 = vmatprep.mubr.msk.f32.mxu1 %vm5237_vm0, %v5236_v1 }
 0x370   : > { %4779 = vmatprep.subr.mxu1 %v5236_v1 }
 0x371   : > { %4780 = vmatpush3.msra.mxu1 %v837_v51 }
 0x372   : > { %4795 = vmatprep.subr.mxu1 %v5236_v1 }
 0x3ba   : > { %v1217_v53 = vpop.f32.mrf.mxu1 }
 0x3bb   : > { %4782 = vmatmul.mubr.msk.f32.vlgmr.msra.gmra.mxu1 %vm1059_vm2, %v1217_v53 }
 0x3bc   : > { %v4759_v54 = vpop.f32.mrf.mxu1  ;;  %4803 = vmatprep.mubr.msk.f32.mxu1 %vm5237_vm0, %v5236_v1  ;;  %4796 = vmatpush3.msra.mxu1 %v1576_v9 }
 0x3bd   : > { %4797 = vmatprep.subr.mxu1 %v5236_v1 }
 0x42e   : > { %v1383_v55 = vpop.f32.mrf.mxu1 }
 0x42f   : > { %4775 = vmatmul.mubr.msk.f32.vlgmr.msra.gmra.mxu0 %vm1059_vm2, %v1383_v55 }
 0x430   : > { %v4769_v56 = vpop.f32.mrf.mxu1  ;;  %4792 = vmatprep.mubr.msk.f32.mxu0 %vm5237_vm0, %v5236_v1  ;;  %4785 = vmatpush3.msra.mxu0 %v1572_v10 }
 0x431   : > { %4786 = vmatprep.subr.mxu0 %v5236_v1 }
 0x432   : > { %4787 = vmatpush3.msra.mxu0 %v1571_v12 }
 0x433   : > { %4788 = vmatprep.subr.mxu0 %v5236_v1 }
 0x434   : > { %4789 = vmatpush3.msra.mxu0 %v1570_v14 }
 0x435   : > { %4790 = vmatprep.subr.mxu0 %v5236_v1 }
 0x436   : > { %4791 = vmatpush3.msra.mxu0 %v1569_v16 }
 0x437   : > { %4806 = vmatprep.subr.mxu0 %v5236_v1 }
 0x47b   : > { %v1529_v57 = vpop.f32.mrf.mxu1 }
 0x47d   : > { %v4783_v58 = vpop.f32.mrf.mxu1 }
 0x4ef   : > { %v1456_v60 = vpop.f32.mrf.mxu0 }
 0x4f0   : > { %v1530_v61 = vadd.f32 %v1529_v57, %v1456_v60 }
 0x4f1   : > { %v4776_v62 = vpop.f32.mrf.mxu0 }
 0x4f2   : > { %v1539_v63 = vadd.f32 %v4429_v59, %v1530_v61  ;;  %v1584_v62 = vld [vmem:[%s6214_s14 + $0x18] sm:$0xff] }
 0x4f4   : > { %v1540_v0 = vadd.f32 %v1539_v63, %v5451_v5  ;;  %v1575_v5 = vld [vmem:[%s6285_s12 + $0x10] sm:$0xff] }
 0x4f5   : > { %4798 = vmatpush3.msra.mxu1 %v1575_v5 }
 0x4f6   : > { %v1541_v2 = vsel %vm844_vm1, %v1540_v0, 0.0  ;;  %4799 = vmatprep.subr.mxu1 %v5236_v1 }
 0x4f7   : > { %1542 = vadd.xlane.f32.xlu1 %v1541_v2  ;;  %4800 = vmatpush3.msra.mxu1 %v1574_v11 }
 0x4f8   : > { %4801 = vmatprep.subr.mxu1 %v5236_v1 }
 0x4f9   : > { %4802 = vmatpush3.msra.mxu1 %v1573_v13  ;;  %v4443_v13 = vld [vmem:[%s6215_s15] ss:$0 sm:$0xff] }
 0x4fa   : > { %4804 = vmatmul.mubr.msk.f32.vlgmr.msra.gmra.mxu1 %vm844_vm1, %v5588_v15  ;;  %4817 = vmatprep.subr.mxu1 %v5236_v1 }
 0x4fb   : > { %4819 = vmatprep.mubr.msk.f32.mxu1 %vm5237_vm0, %v5236_v1 }
 0x580   : > { %v1543_v3 = vpop.xlane.xlu1 %1542 }
 0x581   : > { %v1545_v4 = vmul.f32 0.03125, %v1543_v3 }
 0x583   : > { %v1546_v6 = vsub.f32 %v1540_v0, %v1545_v4  ;;  %v1582_v4 = vld [vmem:[%s6214_s14 + $0x8] sm:$0xff] }
 0x585   : > { %v1547_v7 = vmul.f32 %v1546_v6, %v1546_v6 }
 0x587   : > { %v1548_v8 = vsel %vm844_vm1, %v1547_v7, 0.0  ;;  %v1583_v7 = vld [vmem:[%s6214_s14 + $0x10] sm:$0xff] }
 0x588   : > { %1549 = vadd.xlane.f32.xlu0 %v1548_v8 }
 0x5ba   : > { %v1731_v27 = vpop.f32.mrf.mxu1 }
 0x5bb   : > { %4818 = vmatpush3.xpose.msk.msra.mxu1 %vm1059_vm2, %v1731_v27  ;;  %1967 = vrot.lane.b32.xlu0 %v1731_v27, %s6291_s26 }
 0x5bc   : > { %v4805_v28 = vpop.f32.mrf.mxu1  ;;  %4822 = vmatprep.subr.mxu1 %v5236_v1 }
 0x5bd   : > { %v2315_v28 = vld [vmem:[%s6218_s18 + $0x18] sm:$0xff] }
 0x611   : > { %v1550_v17 = vpop.xlane.xlu0 %1549 }
 0x612   : > { %v1551_v18 = vmul.f32 0.03125, %v1550_v17 }
 0x614   : > { %v1552_v19 = vadd.f32 1e-05, %v1551_v18 }
 0x616   : > { %5138 = vrsqrt.f32 %v1552_v19 }
 0x623   : > { %v5139_v20 = vpop.eup %5138 }
 0x624   : > { %v1554_v22 = vmul.f32 %v5139_v20, %v1546_v6  ;;  %v1581_v6 = vld [vmem:[%s6214_s14] sm:$0xff] }
 0x626   : > { %v1561_v25 = vmul.f32 %v4430_v21, %v1554_v22 }
 0x628   : > { %v5607_v26 = vadd.f32 %v4431_v24, %v1561_v25 }
 0x62a   : > { %4793 = vmatmul.mubr.msk.f32.vlgmr.msra.gmra.mxu0 %vm844_vm1, %v5607_v26 }
 0x62b   : > { %4814 = vmatprep.mubr.msk.f32.mxu0 %vm5237_vm0, %v5236_v1  ;;  %4807 = vmatpush3.msra.mxu0 %v1580_v29  ;;  %v2313_v29 = vld [vmem:[%s6218_s18 + $0x8] sm:$0xff] }
 0x62c   : > { %4808 = vmatprep.subr.mxu0 %v5236_v1 }
 0x62d   : > { %4809 = vmatpush3.msra.mxu0 %v1579_v30  ;;  %v1968_v33 = vpop.permute.xlu0 %1967  ;;  %v2312_v30 = vld [vmem:[%s6218_s18] sm:$0xff] }
 0x62e   : > { %4810 = vmatprep.subr.mxu0 %v5236_v1 }
 0x62f   : > { %4811 = vmatpush3.msra.mxu0 %v1578_v31  ;;  %v2412_v31 = vld [vmem:[%s6220_s20 + $0x78] sm:$0xff] }
 0x630   : > { %4812 = vmatprep.subr.mxu0 %v5236_v1 }
 0x631   : > { %4813 = vmatpush3.msra.mxu0 %v1577_v32  ;;  %v2411_v32 = vld [vmem:[%s6220_s20 + $0x70] sm:$0xff] }
 0x632   : > { %4815 = vmatmul.mubr.msk.f32.vlgmr.msra.gmra.mxu0 %vm844_vm1, %v5588_v15  ;;  %4827 = vmatprep.subr.mxu0 %v5236_v1 }
 0x633   : > { %4829 = vmatprep.mubr.msk.f32.mxu0 %vm5237_vm0, %v5236_v1  ;;  %4828 = vmatpush3.xpose.msk.msra.mxu0 %vm1059_vm2, %v1968_v33  ;;  %v2410_v33 = vld [vmem:[%s6220_s20 + $0x68] sm:$0xff] }
 0x634   : > { %4837 = vmatprep.subr.mxu0 %v5236_v1 }
 0x6ea   : > { %v1657_v34 = vpop.f32.mrf.mxu0 }
 0x6eb   : > { %v1661_v35 = vmul.f32 0.17677669, %v1657_v34  ;;  %v2409_v34 = vld [vmem:[%s6220_s20 + $0x60] sm:$0xff] }
 0x6ec   : > { %v4794_v36 = vpop.f32.mrf.mxu0 }
 0x6ed   : > { %1965 = vrot.lane.b32.xlu0 %v1661_v35, %s6291_s26  ;;  %4820 = vmatmul.mubr.msk.f32.vlgmr.msra.gmra.mxu1 %vm1059_vm2, %v1661_v35  ;;  %v2408_v35 = vld [vmem:[%s6220_s20 + $0x58] sm:$0xff]  ;;  %v2407_v36 = vld [vmem:[%s6220_s20 + $0x50] sm:$0xff] }
 0x6ee   : > { %4824 = vmatprep.mubr.msk.f32.mxu1 %vm5237_vm0, %v5236_v1 }
 0x6f2   : > { %v1801_v37 = vpop.f32.mrf.mxu0 }
 0x6f3   : > { %4823 = vmatpush3.msra.mxu1 %v1801_v37 }
 0x6f4   : > { %v4816_v38 = vpop.f32.mrf.mxu0  ;;  %4832 = vmatprep.subr.mxu1 %v5236_v1 }
 0x6f5   : > { %v2405_v38 = vld [vmem:[%s6220_s20 + $0x40] sm:$0xff] }
 0x75f   : > { %v1966_v39 = vpop.permute.xlu0 %1965 }
 0x760   : > { %4830 = vmatmul.mubr.msk.f32.vlgmr.msra.gmra.mxu0 %vm1059_vm2, %v1966_v39  ;;  %v2404_v39 = vld [vmem:[%s6220_s20 + $0x38] sm:$0xff] }
 0x761   : > { %4841 = vmatprep.mubr.msk.f32.mxu0 %vm5237_vm0, %v5236_v1  ;;  %4838 = vmatpush3.msra.mxu0 %v1584_v62  ;;  %v4448_v62 = vld [vmem:[%s6221_s21] ss:$0 sm:$0xff] }
 0x762   : > { %4839 = vmatprep.subr.mxu0 %v5236_v1 }
 0x763   : > { %4840 = vmatpush3.msra.mxu0 %v1583_v7 }
 0x764   : > { %4851 = vmatprep.subr.mxu0 %v5236_v1 }
 0x7ad   : > { %v1877_v41 = vpop.f32.mrf.mxu1 }
 0x7ae   : > { %v1878_v42 = vadd.f32 %v1877_v41, %v5650_v40  ;;  %v2403_v41 = vld [vmem:[%s6220_s20 + $0x30] sm:$0xff] }
 0x7af   : > { %v4821_v43 = vpop.f32.mrf.mxu1 }
 0x7b0   : > { %v1881_v44 = vsel %vm1136_vm3, %v1878_v42, -inf  ;;  %v2401_v43 = vld [vmem:[%s6220_s20 + $0x20] sm:$0xff] }
 0x7b1   : > { %1882 = vmax.xlane.f32.xlu1 %v1881_v44  ;;  %v2400_v44 = vld [vmem:[%s6220_s20 + $0x18] sm:$0xff] }
 0x820   : > { %v2039_v45 = vpop.f32.mrf.mxu0 }
 0x821   : > { %v2040_v46 = vadd.f32 %v2039_v45, %v5650_v40 }
 0x822   : > { %v4831_v47 = vpop.f32.mrf.mxu0 }
 0x823   : > { %v2043_v48 = vsel %vm1136_vm3, %v2040_v46, -inf }
 0x824   : > { %2044 = vmax.xlane.f32.xlu0 %v2043_v48 }
 0x83a   : > { %v1883_v49 = vpop.xlane.xlu1 %1882 }
 0x83b   : > { %v1884_v50 = vsub.f32 %v1878_v42, %v1883_v49  ;;  %v2402_v42 = vld [vmem:[%s6220_s20 + $0x28] sm:$0xff]  ;;  %v4444_v49 = vld [vmem:[%s6216_s16] ss:$0 sm:$0xff] }
 0x83d   : > { %v1885_v51 = vmul.f32 1.442695, %v1884_v50 }
 0x83f   : > { %5140 = vpow2.f32 %v1885_v51  ;;  %v4445_v51 = vld [vmem:[%s6217_s17] ss:$0 sm:$0xff] }
 0x84c   : > { %v5141_v52 = vpop.eup %5140 }
 0x84d   : > { %v1887_v53 = vsel %vm1136_vm3, %v5141_v52, 0.0 }
 0x84e   : > { %1888 = vadd.xlane.f32.xlu1 %v1887_v53 }
 0x8ad   : > { %v2045_v54 = vpop.xlane.xlu0 %2044 }
 0x8ae   : > { %v2046_v55 = vsub.f32 %v2040_v46, %v2045_v54  ;;  %v2399_v54 = vld [vmem:[%s6220_s20 + $0x10] sm:$0xff] }
 0x8b0   : > { %v2047_v56 = vmul.f32 1.442695, %v2046_v55  ;;  %v2398_v55 = vld [vmem:[%s6220_s20 + $0x8] sm:$0xff] }
 0x8b2   : > { %5142 = vpow2.f32 %v2047_v56  ;;  %v2397_v56 = vld [vmem:[%s6220_s20] sm:$0xff] }
 0x8bf   : > { %v5143_v57 = vpop.eup %5142 }
 0x8c0   : > { %v2049_v58 = vsel %vm1136_vm3, %v5143_v57, 0.0 }
 0x8c1   : > { %2050 = vadd.xlane.f32.xlu1 %v2049_v58 }
 0x8d2   : > { %2055 = vrot.lane.b32.xlu1 %v1801_v37, %s6291_s26  ;;  %v2406_v37 = vld [vmem:[%s6220_s20 + $0x48] sm:$0xff] }
 0x8d7   : > { %v1889_v59 = vpop.xlane.xlu1 %1888 }
 0x8d8   : > { %5144 = vrcp.f32 %v1889_v59 }
 0x8e5   : > { %v5145_v60 = vpop.eup %5144 }
 0x8e6   : > { %v1891_v61 = vmul.f32 %v5145_v60, %v5141_v52 }
 0x8e8   : > { %4825 = vmatmul.mubr.msk.f32.vlgmr.msra.gmra.mxu1 %vm1136_vm3, %v1891_v61 }
 0x8e9   : > { %4834 = vmatprep.mubr.msk.f32.mxu1 %vm5237_vm0, %v5236_v1 }
 0x94a   : > { %v2051_v63 = vpop.xlane.xlu1 %2050 }
 0x94b   : > { %5146 = vrcp.f32 %v2051_v63 }
 0x94e   : > { %v2056_v0 = vpop.permute.xlu1 %2055 }
 0x94f   : > { %4833 = vmatpush3.msra.mxu1 %v2056_v0 }
 0x950   : > { %4844 = vmatprep.subr.mxu1 %v5236_v1 }
 0x958   : > { %v5147_v2 = vpop.eup %5146 }
 0x959   : > { %v2053_v3 = vmul.f32 %v5147_v2, %v5143_v57  ;;  %v4446_v57 = vld [vmem:[%s6219_s19] ss:$0 sm:$0xff] }
 0x95b   : > { %4835 = vmatmul.mubr.msk.f32.vlgmr.msra.gmra.mxu1 %vm1136_vm3, %v2053_v3 }
 0x95c   : > { %4845 = vmatpush3.msra.mxu1 %v1582_v4  ;;  %4848 = vmatprep.mubr.msk.f32.mxu1 %vm5237_vm0, %v5236_v1 }
 0x95d   : > { %4846 = vmatprep.subr.mxu1 %v5236_v1 }
 0x95e   : > { %4847 = vmatpush3.msra.mxu1 %v1581_v6 }
 0x95f   : > { %4862 = vmatprep.subr.mxu1 %v5236_v1 }
 0x9a8   : > { %v1961_v8 = vpop.f32.mrf.mxu1 }
 0x9a9   : > { %4849 = vmatmul.mubr.msk.f32.vlgmr.msra.gmra.mxu1 %vm1059_vm2, %v1961_v8 }
 0x9aa   : > { %v4826_v9 = vpop.f32.mrf.mxu1  ;;  %4894 = vmatprep.mubr.msk.f32.mxu1 %vm5237_vm0, %v5236_v1  ;;  %4863 = vmatpush3.msra.mxu1 %v2412_v31  ;;  %v4460_v31 = vld [vmem:[%s6281_s30 + $0x28] sm:$0xff] }
 0x9ab   : > { %4864 = vmatprep.subr.mxu1 %v5236_v1 }
 0x9ac   : > { %4865 = vmatpush3.msra.mxu1 %v2411_v32  ;;  %v4459_v32 = vld [vmem:[%s6281_s30 + $0x20] sm:$0xff] }
 0x9ad   : > { %4866 = vmatprep.subr.mxu1 %v5236_v1 }
 0x9ae   : > { %4867 = vmatpush3.msra.mxu1 %v2410_v33 }
 0x9af   : > { %4868 = vmatprep.subr.mxu1 %v5236_v1 }
 0x9b0   : > { %4869 = vmatpush3.msra.mxu1 %v2409_v34 }
 0x9b1   : > { %4870 = vmatprep.subr.mxu1 %v5236_v1 }
 0x9b2   : > { %4871 = vmatpush3.msra.mxu1 %v2408_v35 }
 0x9b3   : > { %4872 = vmatprep.subr.mxu1 %v5236_v1 }
 0x9b4   : > { %4873 = vmatpush3.msra.mxu1 %v2407_v36 }
 0x9b5   : > { %4874 = vmatprep.subr.mxu1 %v5236_v1 }
 0x9b6   : > { %4875 = vmatpush3.msra.mxu1 %v2406_v37 }
 0x9b7   : > { %4876 = vmatprep.subr.mxu1 %v5236_v1 }
 0x9b8   : > { %4877 = vmatpush3.msra.mxu1 %v2405_v38 }
 0x9b9   : > { %4878 = vmatprep.subr.mxu1 %v5236_v1 }
 0x9ba   : > { %4879 = vmatpush3.msra.mxu1 %v2404_v39 }
 0x9bb   : > { %4880 = vmatprep.subr.mxu1 %v5236_v1 }
 0x9bc   : > { %4881 = vmatpush3.msra.mxu1 %v2403_v41 }
 0x9bd   : > { %4882 = vmatprep.subr.mxu1 %v5236_v1 }
 0x9be   : > { %4883 = vmatpush3.msra.mxu1 %v2402_v42 }
 0x9bf   : > { %4884 = vmatprep.subr.mxu1 %v5236_v1 }
 0x9c0   : > { %4885 = vmatpush3.msra.mxu1 %v2401_v43 }
 0x9c1   : > { %4886 = vmatprep.subr.mxu1 %v5236_v1 }
 0x9c2   : > { %4887 = vmatpush3.msra.mxu1 %v2400_v44 }
 0x9c3   : > { %4888 = vmatprep.subr.mxu1 %v5236_v1 }
 0x9c4   : > { %4889 = vmatpush3.msra.mxu1 %v2399_v54 }
 0x9c5   : > { %4890 = vmatprep.subr.mxu1 %v5236_v1 }
 0x9c6   : > { %4891 = vmatpush3.msra.mxu1 %v2398_v55 }
 0x9c7   : > { %4892 = vmatprep.subr.mxu1 %v5236_v1 }
 0x9c8   : > { %4893 = vmatpush3.msra.mxu1 %v2397_v56 }
 0x9c9   : > { %4935 = vmatprep.subr.mxu1 %v5236_v1 }
 0xa1b   : > { %v2127_v5 = vpop.f32.mrf.mxu1 }
 0xa1c   : > { %4842 = vmatmul.mubr.msk.f32.vlgmr.msra.gmra.mxu0 %vm1059_vm2, %v2127_v5 }
 0xa1d   : > { %v4836_v10 = vpop.f32.mrf.mxu1  ;;  %4859 = vmatprep.mubr.msk.f32.mxu0 %vm5237_vm0, %v5236_v1  ;;  %4852 = vmatpush3.msra.mxu0 %v2315_v28  ;;  %v4456_v28 = vld [vmem:[%s6280_s6 + $0x28] sm:$0xff] }
 0xa1e   : > { %4853 = vmatprep.subr.mxu0 %v5236_v1  ;;  %v4454_v10 = vld [vmem:[%s6278_s1 + $0x38] sm:$0xff] }
 0xa69   : > { %v2273_v11 = vpop.f32.mrf.mxu1 }
 0xa6b   : > { %v4850_v12 = vpop.f32.mrf.mxu1 }
 0xa6c   : > { %v4452_v12 = vld [vmem:[%s6278_s1 + $0x28] sm:$0xff] }
 0xadc   : > { %v2200_v14 = vpop.f32.mrf.mxu0 }
 0xadd   : > { %v2274_v16 = vadd.f32 %v2273_v11, %v2200_v14  ;;  %v4453_v11 = vld [vmem:[%s6278_s1 + $0x30] sm:$0xff] }
 0xade   : > { %v4843_v17 = vpop.f32.mrf.mxu0 }
 0xadf   : > { %v2283_v18 = vadd.f32 %v4443_v13, %v2274_v16  ;;  %v4451_v13 = vld [vmem:[%s6278_s1 + $0x20] sm:$0xff]  ;;  %s5239_s1 = smov [#allocation2]  }
 0xae1   : > { %v2284_v19 = vadd.f32 %v2283_v18, %v5607_v26  ;;  %v2314_v26 = vld [vmem:[%s6218_s18 + $0x10] sm:$0xff] }
 0xae2   : > { %4854 = vmatpush3.msra.mxu0 %v2314_v26  ;;  %v4455_v26 = vld [vmem:[%s6280_s6 + $0x20] sm:$0xff] }
 0xae3   : > { %v2285_v20 = vsel %vm844_vm1, %v2284_v19, 0.0  ;;  %4855 = vmatprep.subr.mxu0 %v5236_v1 }
 0xae4   : > { %2286 = vadd.xlane.f32.xlu1 %v2285_v20  ;;  %4856 = vmatpush3.msra.mxu0 %v2313_v29  ;;  %v4462_v29 = vld [vmem:[%s6281_s30 + $0x38] sm:$0xff] }
 0xae5   : > { %4857 = vmatprep.subr.mxu0 %v5236_v1 }
 0xae6   : > { %4858 = vmatpush3.msra.mxu0 %v2312_v30  ;;  %v4461_v30 = vld [vmem:[%s6281_s30 + $0x30] sm:$0xff] }
 0xae7   : > { %4897 = vmatprep.subr.mxu0 %v5236_v1 }
 0xb6d   : > { %v2287_v21 = vpop.xlane.xlu1 %2286 }
 0xb6e   : > { %v2288_v22 = vmul.f32 0.03125, %v2287_v21  ;;  %v4450_v21 = vld [vmem:[%s6223_s23] ss:$0 sm:$0xff] }
 0xb70   : > { %v2289_v24 = vsub.f32 %v2284_v19, %v2288_v22  ;;  %v4449_v19 = vld [vmem:[%s6222_s22] ss:$0 sm:$0xff] }
 0xb72   : > { %v2290_v25 = vmul.f32 %v2289_v24, %v2289_v24 }
 0xb74   : > { %v2291_v27 = vsel %vm844_vm1, %v2290_v25, 0.0  ;;  %v4458_v25 = vld [vmem:[%s6280_s6 + $0x38] sm:$0xff] }
 0xb75   : > { %2292 = vadd.xlane.f32.xlu0 %v2291_v27  ;;  %v4457_v27 = vld [vmem:[%s6280_s6 + $0x30] sm:$0xff]  ;;  %s4549_s6 = sshll.u32 %s6295_s28, 7 }
 0xbfe   : > { %v2293_v45 = vpop.xlane.xlu0 %2292 }
 0xbff   : > { %v2294_v46 = vmul.f32 0.03125, %v2293_v45 }
 0xc01   : > { %v2295_v47 = vadd.f32 1e-05, %v2294_v46 }
 0xc03   : > { %5148 = vrsqrt.f32 %v2295_v47 }
 0xc10   : > { %v5149_v48 = vpop.eup %5148 }
 0xc11   : > { %v2297_v50 = vmul.f32 %v5149_v48, %v2289_v24 }
 0xc13   : > { %v2304_v52 = vmul.f32 %v4444_v49, %v2297_v50 }
 0xc15   : > { %v2311_v53 = vadd.f32 %v4445_v51, %v2304_v52 }
 0xc17   : > { %4860 = vmatmul.mubr.msk.f32.vlgmr.msra.gmra.mxu0 %vm844_vm1, %v2311_v53 }
 0xc18   : > { %4905 = vmatprep.mubr.msk.f32.mxu0 %vm5237_vm0, %v5236_v1  ;;  %4898 = vmatpush3.msra.mxu0 %v4454_v10 }
 0xc19   : > { %4899 = vmatprep.subr.mxu0 %v5236_v1 }
 0xc1a   : > { %4900 = vmatpush3.msra.mxu0 %v4453_v11 }
 0xc1b   : > { %4901 = vmatprep.subr.mxu0 %v5236_v1 }
 0xc1c   : > { %4902 = vmatpush3.msra.mxu0 %v4452_v12 }
 0xc1d   : > { %4903 = vmatprep.subr.mxu0 %v5236_v1 }
 0xc1e   : > { %4904 = vmatpush3.msra.mxu0 %v4451_v13 }
 0xc1f   : > { %4908 = vmatprep.subr.mxu0 %v5236_v1 }
 0xcd7   : > { %v2392_v58 = vpop.f32.mrf.mxu0 }
 0xcd8   : > { %v2393_v59 = vadd.f32 %v4446_v57, %v2392_v58 }
 0xcd9   : > { %v4861_v60 = vpop.f32.mrf.mxu0 }
 0xcda   : > { %v2396_v61 = vmax.f32 %v2393_v59, 0.0 }
 0xcdc   : > { %4895 = vmatmul.mubr.f32.vlgmr.msra.gmra.mxu1 %v2396_v61 }
 0xcdd   : > { %4937 = vmatprep.mubr.msk.f32.mxu1 %vm5237_vm0, %v5236_v1 }
 0xd9c   : > { %v2486_v63 = vpop.f32.mrf.mxu1 }
 0xd9d   : > { %v2487_v0 = vadd.f32 %v4448_v62, %v2486_v63  ;;  %v4466_v63 = vld [vmem:[%s6283_s29 + $0x38] sm:$0xff] }
 0xd9e   : > { %v4896_v2 = vpop.f32.mrf.mxu1 }
 0xd9f   : > { %v2490_v3 = vadd.f32 %v2487_v0, %v2311_v53 }
 0xda1   : > { %v2493_v4 = vsel %vm844_vm1, %v2490_v3, 0.0 }
 0xda2   : > { %2494 = vadd.xlane.f32.xlu0 %v2493_v4 }
 0xe2b   : > { %v2495_v6 = vpop.xlane.xlu0 %2494 }
 0xe2c   : > { %v2496_v7 = vmul.f32 0.03125, %v2495_v6  ;;  %v4464_v6 = vld [vmem:[%s6283_s29 + $0x28] sm:$0xff] }
 0xe2e   : > { %v2497_v8 = vsub.f32 %v2490_v3, %v2496_v7  ;;  %v4463_v7 = vld [vmem:[%s6283_s29 + $0x20] sm:$0xff] }
 0xe30   : > { %v2498_v9 = vmul.f32 %v2497_v8, %v2497_v8 }
 0xe32   : > { %v2499_v5 = vsel %vm844_vm1, %v2498_v9, 0.0 }
 0xe33   : > { %2500 = vadd.xlane.f32.xlu0 %v2499_v5 }
 0xebc   : > { %v2501_v14 = vpop.xlane.xlu0 %2500 }
 0xebd   : > { %v2502_v16 = vmul.f32 0.03125, %v2501_v14  ;;  %v4481_v14 = vld [vmem:[%s6284_s9 + $0x1] ss:$0 sm:$0xff]  ;;  %s808_s9 = scalar_lea.vmem [#allocation2], %s4414_s2 }
 0xebe   : > { %s4327_s3 = sshll.u32 %s808_s9, 4  ;;  %s4328_s3 = int_to_ptr.vmem [resolvable:$true] %s4327_s3 }
 0xebf   : > { %v2503_v17 = vadd.f32 1e-05, %v2502_v16  ;;  %s5174_s10 = scalar_lea.vmem %s4328_s3, 128 }
 0xec0   : > { %p5175_p11 = scmp.ne.s32.totalorder %s4328_s3, %s5174_s10 }
 0xec1   : > { %5150 = vrsqrt.f32 %v2503_v17 }
 0xec2   : > { %p5176_p12 = pnand %p5175_p11, %p5413_p5 }
 0xec4   : > { %p5177_p13 = pneg %p5176_p12 }
 0xece   : > { %v5151_v18 = vpop.eup %5150 }
 0xecf   : > { %v2505_v20 = vmul.f32 %v5151_v18, %v2497_v8  ;;  %v4465_v8 = vld [vmem:[%s6283_s29 + $0x30] sm:$0xff] }
 0xed1   : > { %v2512_v22 = vmul.f32 %v4449_v19, %v2505_v20 }
 0xed3   : > { %v5815_v24 = vadd.f32 %v4450_v21, %v2512_v22 }
 0xed5   : > { %4906 = vmatmul.mubr.msk.f32.vlgmr.msra.gmra.mxu0 %vm844_vm1, %v5815_v24 }
 0xed6   : > { %4909 = vmatpush3.msra.mxu0 %v4458_v25  ;;  %4916 = vmatprep.mubr.msk.f32.mxu0 %vm5237_vm0, %v5236_v1 }
 0xed7   : > { %4910 = vmatprep.subr.mxu0 %v5236_v1 }
 0xed8   : > { %4911 = vmatpush3.msra.mxu0 %v4457_v27 }
 0xed9   : > { %4912 = vmatprep.subr.mxu0 %v5236_v1 }
 0xeda   : > { %4913 = vmatpush3.msra.mxu0 %v4456_v28 }
 0xedb   : > { %4914 = vmatprep.subr.mxu0 %v5236_v1 }
 0xedc   : > { %4915 = vmatpush3.msra.mxu0 %v4455_v26 }
 0xedd   : > { %4917 = vmatmul.mubr.msk.f32.vlgmr.msra.gmra.mxu0 %vm844_vm1, %v5815_v24  ;;  %4919 = vmatprep.subr.mxu0 %v5236_v1 }
 0xede   : > { %4920 = vmatpush3.msra.mxu0 %v4462_v29  ;;  %4927 = vmatprep.mubr.msk.f32.mxu0 %vm5237_vm0, %v5236_v1  ;;  %v4491_v29 = vld [vmem:[%s6285_s12 + $0x38] sm:$0xff] }
 0xedf   : > { %4921 = vmatprep.subr.mxu0 %v5236_v1 }
 0xee0   : > { %4922 = vmatpush3.msra.mxu0 %v4461_v30  ;;  %v4487_v30 = vld [vmem:[%s6286_s11 + $0x38] sm:$0xff] }
 0xee1   : > { %4923 = vmatprep.subr.mxu0 %v5236_v1 }
 0xee2   : > { %4924 = vmatpush3.msra.mxu0 %v4460_v31  ;;  %v4489_v31 = vld [vmem:[%s6285_s12 + $0x28] sm:$0xff] }
 0xee3   : > { %4925 = vmatprep.subr.mxu0 %v5236_v1 }
 0xee4   : > { %4926 = vmatpush3.msra.mxu0 %v4459_v32  ;;  %v4486_v32 = vld [vmem:[%s6286_s11 + $0x30] sm:$0xff] }
 0xee5   : > { %4928 = vmatmul.mubr.msk.f32.vlgmr.msra.gmra.mxu0 %vm844_vm1, %v5815_v24  ;;  %4930 = vmatprep.subr.mxu0 %v5236_v1 }
 0xee6   : > { %4932 = vmatprep.mubr.msk.f32.mxu0 %vm5237_vm0, %v5236_v1 }
 0xf95   : > { %v2615_v33 = vpop.f32.mrf.mxu0 }
 0xf96   : > { %v2619_v34 = vmul.f32 0.17677669, %v2615_v33  ;;  %v4488_v33 = vld [vmem:[%s6285_s12 + $0x20] sm:$0xff] }
 0xf97   : > { %v4907_v35 = vpop.f32.mrf.mxu0 }
 0xf98   : > { %2920 = vrot.lane.b32.xlu1 %v2619_v34, %s6291_s26  ;;  %v4484_v35 = vld [vmem:[%s6286_s11 + $0x20] sm:$0xff] }
 0xf9d   : > { %v2686_v36 = vpop.f32.mrf.mxu0 }
 0xf9e   : > { %2922 = vrot.lane.b32.xlu0 %v2686_v36, %s6291_s26  ;;  %4931 = vmatpush3.xpose.msk.msra.mxu0 %vm1059_vm2, %v2686_v36 }
 0xf9f   : > { %v4918_v37 = vpop.f32.mrf.mxu0  ;;  %4940 = vmatprep.subr.mxu0 %v5236_v1 }
 0xfa1   : > { %4933 = vmatmul.mubr.msk.f32.vlgmr.msra.gmra.mxu0 %vm1059_vm2, %v2619_v34  ;;  %v4485_v34 = vld [vmem:[%s6286_s11 + $0x28] sm:$0xff] }
 0xfa2   : > { %4942 = vmatprep.mubr.msk.f32.mxu0 %vm5237_vm0, %v5236_v1 }
 0xfa5   : > { %v2756_v38 = vpop.f32.mrf.mxu0 }
 0xfa6   : > { %4936 = vmatpush3.msra.mxu1 %v2756_v38 }
 0xfa7   : > { %v4929_v39 = vpop.f32.mrf.mxu0  ;;  %4945 = vmatprep.subr.mxu1 %v5236_v1 }
0x100a   : > { %v2921_v42 = vpop.permute.xlu1 %2920 }
0x1010   : > { %v2923_v41 = vpop.permute.xlu0 %2922 }
0x1011   : > { %4941 = vmatpush3.xpose.msk.msra.mxu0 %vm1059_vm2, %v2923_v41  ;;  %v4482_v41 = vld [vmem:[%s6289_s5 + $0x1] ss:$0 sm:$0xff]  ;;  %s6297_s5 = sld [smem:[#allocation28_spill]] }
0x1012   : > { %4950 = vmatprep.subr.mxu0 %v5236_v1 }
0x1014   : > { %4943 = vmatmul.mubr.msk.f32.vlgmr.msra.gmra.mxu0 %vm1059_vm2, %v2921_v42 }
0x1015   : > { %4954 = vmatprep.mubr.msk.f32.mxu0 %vm5237_vm0, %v5236_v1  ;;  %4951 = vmatpush3.msra.mxu0 %v4466_v63 }
0x1016   : > { %4952 = vmatprep.subr.mxu0 %v5236_v1 }
0x1017   : > { %4953 = vmatpush3.msra.mxu0 %v4465_v8 }
0x1018   : > { %4964 = vmatprep.subr.mxu0 %v5236_v1 }
0x1061   : > { %v2832_v43 = vpop.f32.mrf.mxu0 }
0x1062   : > { %v2833_v44 = vadd.f32 %v2832_v43, %v5515_v23  ;;  %v4483_v43 = vld [vmem:[%s6290_s25 + $0x1] ss:$0 sm:$0xff] }
0x1063   : > { %v4934_v45 = vpop.f32.mrf.mxu0 }
0x1064   : > { %v2836_v46 = vsel %vm1136_vm3, %v2833_v44, -inf }
0x1065   : > { %2837 = vmax.xlane.f32.xlu0 %v2836_v46 }
0x10d4   : > { %v2994_v47 = vpop.f32.mrf.mxu0 }
0x10d5   : > { %v2995_v48 = vadd.f32 %v2994_v47, %v5515_v23 }
0x10d6   : > { %v4944_v49 = vpop.f32.mrf.mxu0 }
0x10d7   : > { %v2998_v50 = vsel %vm1136_vm3, %v2995_v48, -inf  ;;  %v4494_v49 = vld [vmem:[%s6292_s13 + $0x30] sm:$0xff] }
0x10d8   : > { %2999 = vmax.xlane.f32.xlu1 %v2998_v50  ;;  %v4493_v50 = vld [vmem:[%s6292_s13 + $0x28] sm:$0xff] }
0x10ee   : > { %v2838_v51 = vpop.xlane.xlu0 %2837 }
0x10ef   : > { %v2839_v52 = vsub.f32 %v2833_v44, %v2838_v51  ;;  %v4492_v51 = vld [vmem:[%s6292_s13 + $0x20] sm:$0xff] }
0x10f1   : > { %v2840_v53 = vmul.f32 1.442695, %v2839_v52 }
0x10f3   : > { %5152 = vpow2.f32 %v2840_v53 }
0x1100   : > { %v5153_v54 = vpop.eup %5152 }
0x1101   : > { %v2842_v55 = vsel %vm1136_vm3, %v5153_v54, 0.0 }
0x1102   : > { %2843 = vadd.xlane.f32.xlu0 %v2842_v55 }
0x1161   : > { %v3000_v56 = vpop.xlane.xlu1 %2999 }
0x1162   : > { %v3001_v57 = vsub.f32 %v2995_v48, %v3000_v56  ;;  %v4495_v48 = vld [vmem:[%s6292_s13 + $0x38] sm:$0xff]  ;;  %s4314_s13 = scalar_lea.sflag [#allocation3], %s806_s4 }
0x1164   : > { %v3002_v58 = vmul.f32 1.442695, %v3001_v57 }
0x1166   : > { %5154 = vpow2.f32 %v3002_v58 }
0x1173   : > { %v5155_v59 = vpop.eup %5154 }
0x1174   : > { %v3004_v60 = vsel %vm1136_vm3, %v5155_v59, 0.0 }
0x1175   : > { %3005 = vadd.xlane.f32.xlu0 %v3004_v60 }
0x118b   : > { %v2844_v23 = vpop.xlane.xlu0 %2843  ;;  %3010 = vrot.lane.b32.xlu0 %v2756_v38, %s6291_s26 }
0x118c   : > { %5156 = vrcp.f32 %v2844_v23 }
0x1199   : > { %v5157_v61 = vpop.eup %5156 }
0x119a   : > { %v2846_v62 = vmul.f32 %v5157_v61, %v5153_v54 }
0x119c   : > { %4938 = vmatmul.mubr.msk.f32.vlgmr.msra.gmra.mxu1 %vm1136_vm3, %v2846_v62 }
0x119d   : > { %4947 = vmatprep.mubr.msk.f32.mxu1 %vm5237_vm0, %v5236_v1 }
0x11fe   : > { %v3006_v0 = vpop.xlane.xlu0 %3005 }
0x11ff   : > { %5158 = vrcp.f32 %v3006_v0 }
0x1202   : > { %v3011_v2 = vpop.permute.xlu0 %3010 }
0x1203   : > { %4946 = vmatpush3.msra.mxu1 %v3011_v2 }
0x1204   : > { %4957 = vmatprep.subr.mxu1 %v5236_v1 }
0x120c   : > { %v5159_v3 = vpop.eup %5158 }
0x120d   : > { %v3008_v4 = vmul.f32 %v5159_v3, %v5155_v59 }
0x120f   : > { %4948 = vmatmul.mubr.msk.f32.vlgmr.msra.gmra.mxu1 %vm1136_vm3, %v3008_v4 }
0x1210   : > { %4958 = vmatpush3.msra.mxu1 %v4464_v6  ;;  %4961 = vmatprep.mubr.msk.f32.mxu1 %vm5237_vm0, %v5236_v1 }
0x1211   : > { %4959 = vmatprep.subr.mxu1 %v5236_v1 }
0x1212   : > { %4960 = vmatpush3.msra.mxu1 %v4463_v7 }
0x1213   : > { %4975 = vmatprep.subr.mxu1 %v5236_v1 }
0x125c   : > { %v2916_v9 = vpop.f32.mrf.mxu1 }
0x125d   : > { %4962 = vmatmul.mubr.msk.f32.vlgmr.msra.gmra.mxu1 %vm1059_vm2, %v2916_v9 }
0x125e   : > { %v4939_v5 = vpop.f32.mrf.mxu1  ;;  %4983 = vmatprep.mubr.msk.f32.mxu1 %vm5237_vm0, %v5236_v1  ;;  %4976 = vmatpush3.msra.mxu1 %v4491_v29 }
0x125f   : > { %4977 = vmatprep.subr.mxu1 %v5236_v1 }
0x12cf   : > { %v3082_v10 = vpop.f32.mrf.mxu1 }
0x12d0   : > { %4955 = vmatmul.mubr.msk.f32.vlgmr.msra.gmra.mxu0 %vm1059_vm2, %v3082_v10 }
0x12d1   : > { %v4949_v11 = vpop.f32.mrf.mxu1  ;;  %4972 = vmatprep.mubr.msk.f32.mxu0 %vm5237_vm0, %v5236_v1  ;;  %4965 = vmatpush3.msra.mxu0 %v4487_v30  ;;  %v4514_v30 = vld [vmem:[%s6215_s15 + $0x1] ss:$0 sm:$0xff] }
0x12d2   : > { %4966 = vmatprep.subr.mxu0 %v5236_v1 }
0x12d3   : > { %4967 = vmatpush3.msra.mxu0 %v4486_v32 }
0x12d4   : > { %4968 = vmatprep.subr.mxu0 %v5236_v1 }
0x12d5   : > { %4969 = vmatpush3.msra.mxu0 %v4485_v34 }
0x12d6   : > { %4970 = vmatprep.subr.mxu0 %v5236_v1 }
0x12d7   : > { %4971 = vmatpush3.msra.mxu0 %v4484_v35 }
0x12d8   : > { %4986 = vmatprep.subr.mxu0 %v5236_v1 }
0x131d   : > { %v3228_v12 = vpop.f32.mrf.mxu1 }
0x131f   : > { %v4963_v13 = vpop.f32.mrf.mxu1 }
0x1390   : > { %v3155_v16 = vpop.f32.mrf.mxu0 }
0x1391   : > { %v3229_v17 = vadd.f32 %v3228_v12, %v3155_v16 }
0x1392   : > { %v4956_v18 = vpop.f32.mrf.mxu0 }
0x1393   : > { %v3238_v19 = vadd.f32 %v4481_v14, %v3229_v17  ;;  %v4499_v14 = vld [vmem:[%s6214_s14 + $0x38] sm:$0xff] }
0x1395   : > { %v3239_v20 = vadd.f32 %v3238_v19, %v5815_v24  ;;  %v4490_v24 = vld [vmem:[%s6285_s12 + $0x30] sm:$0xff]  ;;  %s6165_s12 = scalar_lea.hbm %s6298_s27, %s4549_s6 }
0x1396   : > { %4978 = vmatpush3.msra.mxu1 %v4490_v24 }
0x1397   : > { %v3240_v21 = vsel %vm844_vm1, %v3239_v20, 0.0  ;;  %4979 = vmatprep.subr.mxu1 %v5236_v1 }
0x1398   : > { %3241 = vadd.xlane.f32.xlu1 %v3240_v21  ;;  %4980 = vmatpush3.msra.mxu1 %v4489_v31  ;;  %v4496_v21 = vld [vmem:[%s6214_s14 + $0x20] sm:$0xff] }
0x1399   : > { %4981 = vmatprep.subr.mxu1 %v5236_v1 }
0x139a   : > { %4982 = vmatpush3.msra.mxu1 %v4488_v33 }
0x139b   : > { %4984 = vmatmul.mubr.msk.f32.vlgmr.msra.gmra.mxu1 %vm844_vm1, %v5588_v15  ;;  %4997 = vmatprep.subr.mxu1 %v5236_v1 }
0x139c   : > { %4999 = vmatprep.mubr.msk.f32.mxu1 %vm5237_vm0, %v5236_v1 }
0x1421   : > { %v3242_v22 = vpop.xlane.xlu1 %3241 }
0x1422   : > { %v3243_v25 = vmul.f32 0.03125, %v3242_v22  ;;  %v4498_v22 = vld [vmem:[%s6214_s14 + $0x30] sm:$0xff] }
0x1424   : > { %v3244_v27 = vsub.f32 %v3239_v20, %v3243_v25  ;;  %v4497_v20 = vld [vmem:[%s6214_s14 + $0x28] sm:$0xff] }
0x1426   : > { %v3245_v28 = vmul.f32 %v3244_v27, %v3244_v27 }
0x1428   : > { %v3246_v26 = vsel %vm844_vm1, %v3245_v28, 0.0 }
0x1429   : > { %3247 = vadd.xlane.f32.xlu1 %v3246_v26 }
0x145b   : > { %v3433_v46 = vpop.f32.mrf.mxu1 }
0x145c   : > { %4998 = vmatpush3.xpose.msk.msra.mxu1 %vm1059_vm2, %v3433_v46  ;;  %3669 = vrot.lane.b32.xlu1 %v3433_v46, %s6291_s26  ;;  %v4517_v46 = vld [vmem:[%s6218_s18 + $0x20] sm:$0xff] }
0x145d   : > { %v4985_v47 = vpop.f32.mrf.mxu1  ;;  %5002 = vmatprep.subr.mxu1 %v5236_v1 }
0x145e   : > { %v4539_v47 = vld [vmem:[%s6220_s20 + $0xf8] sm:$0xff] }
0x14b2   : > { %v3248_v36 = vpop.xlane.xlu1 %3247 }
0x14b3   : > { %v3249_v37 = vmul.f32 0.03125, %v3248_v36 }
0x14b5   : > { %v3250_v38 = vadd.f32 1e-05, %v3249_v37 }
0x14b7   : > { %5160 = vrsqrt.f32 %v3250_v38 }
0x14c4   : > { %v5161_v39 = vpop.eup %5160 }
0x14c5   : > { %v3252_v42 = vmul.f32 %v5161_v39, %v3244_v27 }
0x14c7   : > { %v3259_v44 = vmul.f32 %v4482_v41, %v3252_v42 }
0x14c9   : > { %v5958_v45 = vadd.f32 %v4483_v43, %v3259_v44  ;;  %v4520_v43 = vld [vmem:[%s6218_s18 + $0x38] sm:$0xff]  ;;  %v4519_v44 = vld [vmem:[%s6218_s18 + $0x30] sm:$0xff] }
0x14cb   : > { %4973 = vmatmul.mubr.msk.f32.vlgmr.msra.gmra.mxu0 %vm844_vm1, %v5958_v45 }
0x14cc   : > { %4994 = vmatprep.mubr.msk.f32.mxu0 %vm5237_vm0, %v5236_v1  ;;  %4987 = vmatpush3.msra.mxu0 %v4495_v48  ;;  %v4538_v48 = vld [vmem:[%s6220_s20 + $0xf0] sm:$0xff] }
0x14cd   : > { %4988 = vmatprep.subr.mxu0 %v5236_v1 }
0x14ce   : > { %4989 = vmatpush3.msra.mxu0 %v4494_v49  ;;  %v3670_v52 = vpop.permute.xlu1 %3669  ;;  %v4537_v49 = vld [vmem:[%s6220_s20 + $0xe8] sm:$0xff] }
0x14cf   : > { %4990 = vmatprep.subr.mxu0 %v5236_v1 }
0x14d0   : > { %4991 = vmatpush3.msra.mxu0 %v4493_v50  ;;  %v4536_v50 = vld [vmem:[%s6220_s20 + $0xe0] sm:$0xff] }
0x14d1   : > { %4992 = vmatprep.subr.mxu0 %v5236_v1 }
0x14d2   : > { %4993 = vmatpush3.msra.mxu0 %v4492_v51  ;;  %v4535_v51 = vld [vmem:[%s6220_s20 + $0xd8] sm:$0xff] }
0x14d3   : > { %4995 = vmatmul.mubr.msk.f32.vlgmr.msra.gmra.mxu0 %vm844_vm1, %v5588_v15  ;;  %5007 = vmatprep.subr.mxu0 %v5236_v1 }
0x14d4   : > { %5009 = vmatprep.mubr.msk.f32.mxu0 %vm5237_vm0, %v5236_v1  ;;  %5008 = vmatpush3.xpose.msk.msra.mxu0 %vm1059_vm2, %v3670_v52  ;;  %v4534_v52 = vld [vmem:[%s6220_s20 + $0xd0] sm:$0xff] }
0x14d5   : > { %5017 = vmatprep.subr.mxu0 %v5236_v1 }
0x158b   : > { %v3362_v53 = vpop.f32.mrf.mxu0 }
0x158c   : > { %v3366_v54 = vmul.f32 0.17677669, %v3362_v53  ;;  %v4533_v53 = vld [vmem:[%s6220_s20 + $0xc8] sm:$0xff] }
0x158d   : > { %v4974_v55 = vpop.f32.mrf.mxu0 }
0x158e   : > { %3667 = vrot.lane.b32.xlu0 %v3366_v54, %s6291_s26  ;;  %5000 = vmatmul.mubr.msk.f32.vlgmr.msra.gmra.mxu1 %vm1059_vm2, %v3366_v54  ;;  %v4532_v54 = vld [vmem:[%s6220_s20 + $0xc0] sm:$0xff]  ;;  %v4531_v55 = vld [vmem:[%s6220_s20 + $0xb8] sm:$0xff] }
0x158f   : > { %5004 = vmatprep.mubr.msk.f32.mxu1 %vm5237_vm0, %v5236_v1 }
0x1593   : > { %v3503_v15 = vpop.f32.mrf.mxu0 }
0x1594   : > { %5003 = vmatpush3.msra.mxu1 %v3503_v15 }
0x1595   : > { %v4996_v56 = vpop.f32.mrf.mxu0  ;;  %5012 = vmatprep.subr.mxu1 %v5236_v1 }
0x1596   : > { %v4529_v56 = vld [vmem:[%s6220_s20 + $0xa8] sm:$0xff] }
0x1600   : > { %v3668_v57 = vpop.permute.xlu0 %3667 }
0x1601   : > { %5010 = vmatmul.mubr.msk.f32.vlgmr.msra.gmra.mxu0 %vm1059_vm2, %v3668_v57  ;;  %v4528_v57 = vld [vmem:[%s6220_s20 + $0xa0] sm:$0xff] }
0x1602   : > { %5021 = vmatprep.mubr.msk.f32.mxu0 %vm5237_vm0, %v5236_v1  ;;  %5018 = vmatpush3.msra.mxu0 %v4499_v14 }
0x1603   : > { %5019 = vmatprep.subr.mxu0 %v5236_v1 }
0x1604   : > { %5020 = vmatpush3.msra.mxu0 %v4498_v22 }
0x1605   : > { %5031 = vmatprep.subr.mxu0 %v5236_v1 }
0x164e   : > { %v3579_v58 = vpop.f32.mrf.mxu1 }
0x164f   : > { %v3580_v59 = vadd.f32 %v3579_v58, %v5650_v40  ;;  %v4527_v58 = vld [vmem:[%s6220_s20 + $0x98] sm:$0xff] }
0x1650   : > { %v5001_v60 = vpop.f32.mrf.mxu1 }
0x1651   : > { %v3583_v23 = vsel %vm1136_vm3, %v3580_v59, -inf }
0x1652   : > { %3584 = vmax.xlane.f32.xlu0 %v3583_v23 }
0x16c1   : > { %v3741_v61 = vpop.f32.mrf.mxu0 }
0x16c2   : > { %v3742_v62 = vadd.f32 %v3741_v61, %v5650_v40 }
0x16c3   : > { %v5011_v63 = vpop.f32.mrf.mxu0 }
0x16c4   : > { %v3745_v0 = vsel %vm1136_vm3, %v3742_v62, -inf }
0x16c5   : > { %3746 = vmax.xlane.f32.xlu1 %v3745_v0  ;;  %v4516_v0 = vld [vmem:[%s6217_s17 + $0x1] ss:$0 sm:$0xff] }
0x16db   : > { %v3585_v2 = vpop.xlane.xlu0 %3584 }
0x16dc   : > { %v3586_v3 = vsub.f32 %v3580_v59, %v3585_v2 }
0x16de   : > { %v3587_v4 = vmul.f32 1.442695, %v3586_v3 }
0x16e0   : > { %5162 = vpow2.f32 %v3587_v4  ;;  %v4526_v4 = vld [vmem:[%s6220_s20 + $0x90] sm:$0xff] }
0x16ed   : > { %v5163_v6 = vpop.eup %5162 }
0x16ee   : > { %v3589_v7 = vsel %vm1136_vm3, %v5163_v6, 0.0 }
0x16ef   : > { %3590 = vadd.xlane.f32.xlu0 %v3589_v7  ;;  %v4524_v7 = vld [vmem:[%s6220_s20 + $0x80] sm:$0xff] }
0x174e   : > { %v3747_v8 = vpop.xlane.xlu1 %3746 }
0x174f   : > { %v3748_v9 = vsub.f32 %v3742_v62, %v3747_v8  ;;  %v4515_v62 = vld [vmem:[%s6216_s16 + $0x1] ss:$0 sm:$0xff] }
0x1750   : > { %v4522_v8 = vld [vmem:[%s6219_s19 + $0x1] ss:$0 sm:$0xff] }
0x1751   : > { %v3749_v5 = vmul.f32 1.442695, %v3748_v9 }
0x1753   : > { %5164 = vpow2.f32 %v3749_v5 }
0x1760   : > { %v5165_v10 = vpop.eup %5164 }
0x1761   : > { %v3751_v11 = vsel %vm1136_vm3, %v5165_v10, 0.0 }
0x1762   : > { %3752 = vadd.xlane.f32.xlu0 %v3751_v11 }
0x1778   : > { %v3591_v40 = vpop.xlane.xlu0 %3590  ;;  %3757 = vrot.lane.b32.xlu0 %v3503_v15, %s6291_s26  ;;  %v4530_v15 = vld [vmem:[%s6220_s20 + $0xb0] sm:$0xff] }
0x1779   : > { %5166 = vrcp.f32 %v3591_v40  ;;  %v4541_v40 = vld [vmem:[%s6221_s21 + $0x1] ss:$0 sm:$0xff] }
0x1786   : > { %v5167_v12 = vpop.eup %5166 }
0x1787   : > { %v3593_v13 = vmul.f32 %v5167_v12, %v5163_v6  ;;  %v4525_v6 = vld [vmem:[%s6220_s20 + $0x88] sm:$0xff] }
0x1789   : > { %5005 = vmatmul.mubr.msk.f32.vlgmr.msra.gmra.mxu1 %vm1136_vm3, %v3593_v13 }
0x178a   : > { %5014 = vmatprep.mubr.msk.f32.mxu1 %vm5237_vm0, %v5236_v1 }
0x17eb   : > { %v3753_v16 = vpop.xlane.xlu0 %3752 }
0x17ec   : > { %5168 = vrcp.f32 %v3753_v16 }
0x17ef   : > { %v3758_v17 = vpop.permute.xlu0 %3757 }
0x17f0   : > { %5013 = vmatpush3.msra.mxu1 %v3758_v17 }
0x17f1   : > { %5024 = vmatprep.subr.mxu1 %v5236_v1 }
0x17f9   : > { %v5169_v18 = vpop.eup %5168 }
0x17fa   : > { %v3755_v19 = vmul.f32 %v5169_v18, %v5165_v10 }
0x17fc   : > { %5015 = vmatmul.mubr.msk.f32.vlgmr.msra.gmra.mxu1 %vm1136_vm3, %v3755_v19 }
0x17fd   : > { %5025 = vmatpush3.msra.mxu1 %v4497_v20  ;;  %5028 = vmatprep.mubr.msk.f32.mxu1 %vm5237_vm0, %v5236_v1 }
0x17fe   : > { %5026 = vmatprep.subr.mxu1 %v5236_v1 }
0x17ff   : > { %5027 = vmatpush3.msra.mxu1 %v4496_v21 }
0x1800   : > { %5042 = vmatprep.subr.mxu1 %v5236_v1 }
0x1849   : > { %v3663_v25 = vpop.f32.mrf.mxu1 }
0x184a   : > { %5029 = vmatmul.mubr.msk.f32.vlgmr.msra.gmra.mxu1 %vm1059_vm2, %v3663_v25  ;;  %v4231_v25 = vld [vmem:[%s6224_s24 + $0x18] sm:$0xff] }
0x184b   : > { %v5006_v27 = vpop.f32.mrf.mxu1  ;;  %5074 = vmatprep.mubr.msk.f32.mxu1 %vm5237_vm0, %v5236_v1  ;;  %5043 = vmatpush3.msra.mxu1 %v4539_v47 }
0x184c   : > { %5044 = vmatprep.subr.mxu1 %v5236_v1  ;;  %v4230_v27 = vld [vmem:[%s6224_s24 + $0x10] sm:$0xff] }
0x184d   : > { %5045 = vmatpush3.msra.mxu1 %v4538_v48 }
0x184e   : > { %5046 = vmatprep.subr.mxu1 %v5236_v1 }
0x184f   : > { %5047 = vmatpush3.msra.mxu1 %v4537_v49 }
0x1850   : > { %5048 = vmatprep.subr.mxu1 %v5236_v1 }
0x1851   : > { %5049 = vmatpush3.msra.mxu1 %v4536_v50 }
0x1852   : > { %5050 = vmatprep.subr.mxu1 %v5236_v1 }
0x1853   : > { %5051 = vmatpush3.msra.mxu1 %v4535_v51 }
0x1854   : > { %5052 = vmatprep.subr.mxu1 %v5236_v1 }
0x1855   : > { %5053 = vmatpush3.msra.mxu1 %v4534_v52 }
0x1856   : > { %5054 = vmatprep.subr.mxu1 %v5236_v1 }
0x1857   : > { %5055 = vmatpush3.msra.mxu1 %v4533_v53 }
0x1858   : > { %5056 = vmatprep.subr.mxu1 %v5236_v1 }
0x1859   : > { %5057 = vmatpush3.msra.mxu1 %v4532_v54 }
0x185a   : > { %5058 = vmatprep.subr.mxu1 %v5236_v1 }
0x185b   : > { %5059 = vmatpush3.msra.mxu1 %v4531_v55 }
0x185c   : > { %5060 = vmatprep.subr.mxu1 %v5236_v1 }
0x185d   : > { %5061 = vmatpush3.msra.mxu1 %v4530_v15 }
0x185e   : > { %5062 = vmatprep.subr.mxu1 %v5236_v1 }
0x185f   : > { %5063 = vmatpush3.msra.mxu1 %v4529_v56 }
0x1860   : > { %5064 = vmatprep.subr.mxu1 %v5236_v1 }
0x1861   : > { %5065 = vmatpush3.msra.mxu1 %v4528_v57 }
0x1862   : > { %5066 = vmatprep.subr.mxu1 %v5236_v1 }
0x1863   : > { %5067 = vmatpush3.msra.mxu1 %v4527_v58 }
0x1864   : > { %5068 = vmatprep.subr.mxu1 %v5236_v1 }
0x1865   : > { %5069 = vmatpush3.msra.mxu1 %v4526_v4 }
0x1866   : > { %5070 = vmatprep.subr.mxu1 %v5236_v1 }
0x1867   : > { %5071 = vmatpush3.msra.mxu1 %v4525_v6 }
0x1868   : > { %5072 = vmatprep.subr.mxu1 %v5236_v1 }
0x1869   : > { %5073 = vmatpush3.msra.mxu1 %v4524_v7 }
0x18bc   : > { %v3829_v28 = vpop.f32.mrf.mxu1 }
0x18bd   : > { %5022 = vmatmul.mubr.msk.f32.vlgmr.msra.gmra.mxu0 %vm1059_vm2, %v3829_v28  ;;  %v4229_v28 = vld [vmem:[%s6224_s24 + $0x8] sm:$0xff] }
0x18be   : > { %v5016_v26 = vpop.f32.mrf.mxu1  ;;  %5039 = vmatprep.mubr.msk.f32.mxu0 %vm5237_vm0, %v5236_v1  ;;  %5032 = vmatpush3.msra.mxu0 %v4520_v43 }
0x18bf   : > { %5033 = vmatprep.subr.mxu0 %v5236_v1  ;;  %v4228_v26 = vld [vmem:[%s6224_s24] sm:$0xff] }
0x18c0   : > { %5034 = vmatpush3.msra.mxu0 %v4519_v44 }
0x18c1   : > { %5035 = vmatprep.subr.mxu0 %v5236_v1 }
0x190a   : > { %v3975_v29 = vpop.f32.mrf.mxu1 }
0x190c   : > { %v5030_v24 = vpop.f32.mrf.mxu1 }
0x197d   : > { %v3902_v31 = vpop.f32.mrf.mxu0 }
0x197e   : > { %v3976_v32 = vadd.f32 %v3975_v29, %v3902_v31 }
0x197f   : > { %v5023_v33 = vpop.f32.mrf.mxu0 }
0x1980   : > { %v3985_v34 = vadd.f32 %v4514_v30, %v3976_v32  ;;  %v4544_v32 = vld [vmem:[%s6222_s22 + $0x1] ss:$0 sm:$0xff] }
0x1982   : > { %v3986_v35 = vadd.f32 %v3985_v34, %v5958_v45  ;;  %v4518_v45 = vld [vmem:[%s6218_s18 + $0x28] sm:$0xff]  ;;  %v4545_v34 = vld [vmem:[%s6223_s23 + $0x1] ss:$0 sm:$0xff] }
0x1983   : > { %5036 = vmatpush3.msra.mxu0 %v4518_v45 }
0x1984   : > { %v3987_v36 = vsel %vm844_vm1, %v3986_v35, 0.0  ;;  %5037 = vmatprep.subr.mxu0 %v5236_v1 }
0x1985   : > { %3988 = vadd.xlane.f32.xlu1 %v3987_v36  ;;  %5038 = vmatpush3.msra.mxu0 %v4517_v46 }
0x1986   : > { %5077 = vmatprep.subr.mxu0 %v5236_v1 }
0x1a0e   : > { %v3989_v37 = vpop.xlane.xlu1 %3988 }
0x1a0f   : > { %v3990_v38 = vmul.f32 0.03125, %v3989_v37 }
0x1a11   : > { %v3991_v39 = vsub.f32 %v3986_v35, %v3990_v38 }
0x1a13   : > { %v3992_v41 = vmul.f32 %v3991_v39, %v3991_v39 }
0x1a15   : > { %v3993_v42 = vsel %vm844_vm1, %v3992_v41, 0.0 }
0x1a16   : > { %3994 = vadd.xlane.f32.xlu1 %v3993_v42 }
0x1a9f   : > { %v3995_v59 = vpop.xlane.xlu1 %3994 }
0x1aa0   : > { %v3996_v60 = vmul.f32 0.03125, %v3995_v59 }
0x1aa2   : > { %v3997_v23 = vadd.f32 1e-05, %v3996_v60 }
0x1aa4   : > { %5170 = vrsqrt.f32 %v3997_v23 }
0x1ab1   : > { %v5171_v61 = vpop.eup %5170 }
0x1ab2   : > { %v3999_v63 = vmul.f32 %v5171_v61, %v3991_v39 }
0x1ab4   : > { %v4006_v2 = vmul.f32 %v4515_v62, %v3999_v63 }
0x1ab6   : > { %v4013_v3 = vadd.f32 %v4516_v0, %v4006_v2 }
0x1ab8   : > { %5040 = vmatmul.mubr.msk.f32.vlgmr.msra.gmra.mxu0 %vm844_vm1, %v4013_v3 }
0x1ab9   : > { %5085 = vmatprep.mubr.msk.f32.mxu0 %vm5237_vm0, %v5236_v1  ;;  %5078 = vmatpush3.msra.mxu0 %v4231_v25 }
0x1aba   : > { %5079 = vmatprep.subr.mxu0 %v5236_v1 }
0x1abb   : > { %5080 = vmatpush3.msra.mxu0 %v4230_v27 }
0x1abc   : > { %5081 = vmatprep.subr.mxu0 %v5236_v1 }
0x1abd   : > { %5082 = vmatpush3.msra.mxu0 %v4229_v28 }
0x1abe   : > { %5083 = vmatprep.subr.mxu0 %v5236_v1  ;;  %v4546_v1 = vld [vmem:[%s6297_s5] ss:$0 sm:$0xff]  ;;  %s5178_s5 = sshll.u32 %s5239_s1, 4  ;;  %s5179_s5 = int_to_ptr.vmem [resolvable:$false] %s5178_s5 }
0x1abf   : > { %5084 = vmatpush3.msra.mxu0 %v4228_v26  ;;  %s5180_s28 = scalar_lea.vmem %s5179_s5, 256  ;;  %p5181_p0 = scmp.lt.s32.totalorder %s4328_s3, %s5179_s5 }
0x1ac0   : > { %p5182_p1 = scmp.lt.s32.totalorder %s5180_s28, %s5174_s10 }
0x1ac2   : > { %p5183_p2 = por %p5182_p1, %p5181_p0 }
0x1ac4   : > { %p5184_p3 = pnand %p5183_p2, %p5177_p13 }
0x1b78   : > { %v4096_v9 = vpop.f32.mrf.mxu0 }
0x1b79   : > { %v4097_v5 = vadd.f32 %v4522_v8, %v4096_v9 }
0x1b7a   : > { %v5041_v10 = vpop.f32.mrf.mxu0 }
0x1b7b   : > { %v4100_v11 = vmax.f32 %v4097_v5, 0.0 }
0x1b7d   : > { %5075 = vmatmul.mubr.f32.vlgmr.msra.gmra.mxu1 %v4100_v11 }
0x1c3d   : > { %v4192_v12 = vpop.f32.mrf.mxu1 }
0x1c3e   : > { %v4193_v13 = vadd.f32 %v4541_v40, %v4192_v12 }
0x1c3f   : > { %v5076_v14 = vpop.f32.mrf.mxu1 }
0x1c40   : > { %v4196_v16 = vadd.f32 %v4193_v13, %v4013_v3 }
0x1c42   : > { %v4201_v17 = vsel %vm844_vm1, %v4196_v16, 0.0 }
0x1c43   : > { %4202 = vadd.xlane.f32.xlu1 %v4201_v17 }
0x1ccc   : > { %v4203_v18 = vpop.xlane.xlu1 %4202 }
0x1ccd   : > { %v4204_v19 = vmul.f32 0.03125, %v4203_v18 }
0x1ccf   : > { %v4205_v20 = vsub.f32 %v4196_v16, %v4204_v19 }
0x1cd1   : > { %v4206_v21 = vmul.f32 %v4205_v20, %v4205_v20 }
0x1cd3   : > { %v4207_v22 = vsel %vm844_vm1, %v4206_v21, 0.0 }
0x1cd4   : > { %4208 = vadd.xlane.f32.xlu1 %v4207_v22 }
0x1d5d   : > { %v4209_v29 = vpop.xlane.xlu1 %4208 }
0x1d5e   : > { %v4210_v24 = vmul.f32 0.03125, %v4209_v29 }
0x1d60   : > { %v4211_v30 = vadd.f32 1e-05, %v4210_v24 }
0x1d62   : > { %5172 = vrsqrt.f32 %v4211_v30 }
0x1d6f   : > { %v5173_v31 = vpop.eup %5172 }
0x1d70   : > { %v4213_v33 = vmul.f32 %v5173_v31, %v4205_v20 }
0x1d72   : > { %v4220_v35 = vmul.f32 %v4544_v32, %v4213_v33 }
0x1d74   : > { %v4227_v36 = vadd.f32 %v4545_v34, %v4220_v35 }
0x1d76   : > { %5086 = vmatmul.mubr.msk.f32.vlgmr.msra.gmra.mxu0 %vm844_vm1, %v4227_v36 }
0x1e36   : > { %v4308_v37 = vpop.f32.mrf.mxu0 }
0x1e37   : > { %v4309_v38 = vadd.f32 %v4546_v1, %v4308_v37 }
0x1e38   : > { %v5087_v39 = vpop.f32.mrf.mxu0 }
0x1e39   : > { %4312 = vst [vmem:[%s808_s9] sm:$0xff] %v4309_v38 }
0x1e3a   : > { %5187 = shalt.err (!%p5184_p3)
}
0x1e3b   : > { %s5188_s11 = scalar_lea.hbm %s6165_s12, 128  ;;  %s5192_s4 = scalar_lea.hbm %s6299_s8, 256 }
0x1e3c   : > { %p5189_p4 = scmp.ne.s32.totalorder %s6165_s12, %s5188_s11  ;;  %p5193_p9 = scmp.lt.s32.totalorder %s6165_s12, %s6299_s8 }
0x1e3d   : > { %p5194_p10 = scmp.lt.s32.totalorder %s5192_s4, %s5188_s11 }
0x1e3e   : > { %p5190_p7 = pnand %p5189_p4, %p5413_p5 }
0x1e3f   : > { %p5195_p11 = por %p5194_p10, %p5193_p9 }
0x1e40   : > { %p5191_p8 = pneg %p5190_p7 }
0x1e42   : > { %p5196_p12 = pnand %p5195_p11, %p5191_p8 }
0x1e44   : > { %5199 = shalt.err (!%p5196_p12)
}
0x1e45   : > { %5088 = dma.vmem_to_hbm [thread:$0]  (%p5413_p5), %s4328_s3, 128, %s6165_s12, %s4314_s13  }
0x1e46 PF: > { %s6300_s0 = sld [smem:[#allocation8_spill]] }
0x1e47   : > { %s6301_s27 = sld [smem:[#allocation5_spill]] }
0x1e4c   : > { %p5094_p13 = scmp.ge.s32.totalorder %s6300_s0, 2 }
0x1e4d   : > { %s4339_s1 = sand.u32 1, %s6301_s27  }
0x1e4e   : > { %p5091_p0 = pnand %p5094_p13, %p5417_p6  ;;  %s4340_s5 = scalar_lea.sflag [#allocation3], %s4339_s1 }
0x1e50   : > { %p5092_p1 = pneg %p5091_p0 }
0x1e52   : > { %5217 = dma.done.wait (%p5092_p1), %s4340_s5, 128  }
0x1e53   : > { %5219 = vsyncadd (%p5092_p1), %s4340_s5, 4294967168  ;;  %s6303_s28 = sld [smem:[#allocation10_spill]] }
0x1e54   : > { %s6304_s27 = sld [smem:[#allocation6_spill]] }
0x1e55   : > { %s6305_s3 = sld [smem:[#allocation7_spill]] }
0x1e56   : > { %s6306_s7 = sld [smem:[#allocation11_spill]] }
0x1e59   : > { %p36_p2 = scmp.ge.s32.totalorder %s6303_s28, 4  }
0x1e5b   :  { %38 = sbr.rel (!%p36_p2) target bundleno = 20 (0x14), region = 185 }
0x1e60   :  { %4345 = vsyncpa [#allocation3], 1 }
0x1e61   :  { %4347 = vsyncpa [#allocation3 + $0x1], 1 }

</bundles_post_ra>
